<compile_context>
chip_gen: v6e
topology: v6e:2x2x1
jax: 0.10.0
libtpu: 0.0.40
codegen_flags: <defaults>
</compile_context>

<pallas_src>
import functools

import jax
import jax.numpy as jnp
import numpy as np
from jax.experimental import pallas as pl
from jax.experimental.pallas import tpu as pltpu


# ----------------------------------------------------------------------------
# One dilated LSTM cell over a time-major-flat sequence (traced helper inside
# the fused kernel; all operands are VMEM-resident).
#   seq    : (T*B, F) f32 value, row = t*B + b (time-major flattened)
#   wx_b16 : (F, 4H) bf16,  wh_b16 : (H, 4H) bf16,  b : (1, 4H) f32 (= b_ih+b_hh)
#   gx_ref : (tp_max*B, 4H) f32 VMEM scratch (gates_x slab, reused per cell)
#   h_ref  : (tp_max*B, H)  f32 VMEM scratch (per-cell output slab, reused)
#   returns (T*B, H) f32 value.
# ----------------------------------------------------------------------------
def _run_cell(seq, wx_b16, wh_b16, b, d, gx_ref, h_ref, T, B, H):
    TB = T * B
    n_macro = -(-T // d)                  # ceil(T / d)
    t_pad = n_macro * d
    dB = d * B

    # Hoisted input projection + bias: ONE bf16 MXU matmul (f32 accumulate) for
    # the whole sequence, written straight into VMEM scratch (no concat).
    gx_ref[0:TB, :] = (
        jnp.dot(seq.astype(jnp.bfloat16), wx_b16,
                preferred_element_type=jnp.float32) + b)
    if t_pad > T:
        # Zero-fill the tail (instead of a jnp.concatenate copy) so the padded
        # macro-step rows stay finite; those rows are never read back.
        gx_ref[TB:t_pad * B, :] = jnp.zeros(((t_pad - T) * B, 4 * H), jnp.float32)

    h_state = jnp.zeros((dB, H), jnp.float32)
    c_state = jnp.zeros((dB, H), jnp.float32)
    # Macro-step k covers timesteps [k*d, (k+1)*d); those d residue classes are
    # mutually independent, so the recurrent matmul is batched over d*B rows.
    # TODO(synk): for large T use lax.fori_loop (carry=(h,c), pl.ds chunks) and
    # hold Wh in the MXU (matmul_push_rhs/acc_lhs/pop) across the loop.
    for k in range(n_macro):              # static unroll (T is small)
        g = gx_ref[k * dB:(k + 1) * dB, :] + jnp.dot(
            h_state.astype(jnp.bfloat16), wh_b16,
            preferred_element_type=jnp.float32)
        # Full-lane nonlinearities: one sigmoid + one tanh over the whole
        # (dB, 4H) block (2 EUP passes) instead of four 32-lane slices.
        sg = jax.nn.sigmoid(g)
        th = jnp.tanh(g)
        i_g = sg[:, 0 * H:1 * H]          # PyTorch nn.LSTM gate order: i, f, g, o
        f_g = sg[:, 1 * H:2 * H]
        g_g = th[:, 2 * H:3 * H]
        o_g = sg[:, 3 * H:4 * H]
        c_state = f_g * c_state + i_g * g_g          # elementwise stays f32 (v5e-safe)
        h_state = o_g * jnp.tanh(c_state)
        h_ref[k * dB:(k + 1) * dB, :] = h_state      # direct store, no outs list/concat
    return h_ref[0:TB, :]                            # padded rows dropped by not reading


# ----------------------------------------------------------------------------
# Fused kernel: whole ResidualDRNN stack in a single grid-less pallas_call.
#   x_ref   : (T*B, F0) f32
#   wx0_ref : (F0, 4H) bf16       (first cell of group 0)
#   wxr_ref : (max(n-1,1), H, 4H) bf16   (all other cells; dummy if n_cells==1)
#   wh_ref  : (n, H, 4H) bf16
#   b_ref   : (n, 1, 4H) f32
#   o_ref   : (T*B, H) f32
#   gx_ref / h_ref : VMEM scratch slabs reused by every cell.
# ----------------------------------------------------------------------------
def _drnn_stack_kernel(x_ref, wx0_ref, wxr_ref, wh_ref, b_ref, o_ref,
                       gx_ref, h_ref, *, dilations, T, B, H):
    seq = x_ref[...]                                   # (T*B, F0) f32
    cell = 0
    for g_idx, dil_group in enumerate(dilations):
        group_in = seq                                 # residual source
        h = seq
        for d in dil_group:
            wx = wx0_ref[...] if cell == 0 else wxr_ref[cell - 1]
            h = _run_cell(h, wx, wh_ref[cell], b_ref[cell], d,
                          gx_ref, h_ref, T, B, H)
            cell += 1
        if g_idx > 0:
            h = h + group_in                           # residual add, fused
        seq = h
    o_ref[...] = seq.astype(o_ref.dtype)               # single whole-slab store


def residual_drnn_forward(input_data, params, config):
    """input_data: (T, B, F0) time-major f32. Returns (T, B, H) f32."""
    assert config['rnn_cell_type'] == 'LSTM'
    # TODO(synk): GRU / vanilla-RNN DRNN cell types are not implemented (config uses LSTM).
    T, B, F0 = input_data.shape
    H = config['state_hsize']
    dilations = tuple(tuple(g) for g in config['dilations'])

    cells = [c for grp in params for c in grp]         # (wx(F,4H), wh(H,4H), b(1,4H)) f32
    n_cells = len(cells)

    # Pack weights into 4 stacked slabs (5 prologue DMAs total incl. x instead
    # of 14).  MXU operands are pre-cast to bf16 (halves weight DMA bytes too).
    wx0 = cells[0][0].astype(jnp.bfloat16)                                   # (F0, 4H)
    if n_cells > 1:
        wx_rest = jnp.stack([c[0] for c in cells[1:]]).astype(jnp.bfloat16)  # (n-1, H, 4H)
    else:
        wx_rest = jnp.zeros((1, H, 4 * H), jnp.bfloat16)                     # dummy, unused
    wh_all = jnp.stack([c[1] for c in cells]).astype(jnp.bfloat16)           # (n, H, 4H)
    b_all = jnp.stack([c[2] for c in cells])                                 # (n, 1, 4H) f32

    tp_max = max(-(-T // d) * d for grp in dilations for d in grp)           # max padded T

    kernel = functools.partial(_drnn_stack_kernel, dilations=dilations,
                               T=T, B=B, H=H)
    out_flat = pl.pallas_call(
        kernel,
        out_shape=jax.ShapeDtypeStruct((T * B, H), jnp.float32),
        in_specs=[pl.BlockSpec(memory_space=pltpu.MemorySpace.VMEM)] * 5,
        out_specs=pl.BlockSpec(memory_space=pltpu.MemorySpace.VMEM),
        scratch_shapes=[pltpu.VMEM((tp_max * B, 4 * H), jnp.float32),   # gates_x slab
                        pltpu.VMEM((tp_max * B, H), jnp.float32)],      # per-cell h slab
    )(input_data.reshape(T * B, F0), wx0, wx_rest, wh_all, b_all)
    return out_flat.reshape(T, B, H)


# ----------------------------------------------------------------------------
# Parameter construction (deterministic, PyTorch-nn.LSTM-style uniform init).
# Per cell: (wx:(F,4H), wh:(H,4H), b:(1,4H)=b_ih+b_hh), all f32.
# ----------------------------------------------------------------------------
def init_residual_drnn_params(key, config):
    H = config['state_hsize']
    k = 1.0 / np.sqrt(H)
    params = []
    for grp_num, dil_group in enumerate(config['dilations']):
        if grp_num == 0:
            group_in = config['input_size'] + config['num_of_categories']
        else:
            group_in = H
        group_params = []
        for cell_idx, _ in enumerate(dil_group):
            F = group_in if cell_idx == 0 else H
            key, k1, k2, k3, k4 = jax.random.split(key, 5)
            w_ih = jax.random.uniform(k1, (4 * H, F), jnp.float32, -k, k)
            w_hh = jax.random.uniform(k2, (4 * H, H), jnp.float32, -k, k)
            b_ih = jax.random.uniform(k3, (4 * H,), jnp.float32, -k, k)
            b_hh = jax.random.uniform(k4, (4 * H,), jnp.float32, -k, k)
            group_params.append((w_ih.T, w_hh.T, (b_ih + b_hh)[None, :]))
        params.append(group_params)
    return params


# ----------------------------------------------------------------------------
# Pure-JAX reference (per-timestep dilated LSTM, no Pallas) for correctness.
# bf16_matmul=True mirrors the kernel's bf16-operand / f32-accumulate matmuls.
# ----------------------------------------------------------------------------
def _dilated_lstm_ref(x, wx, wh, b, d, bf16_matmul):
    T, B, _ = x.shape
    H = wh.shape[0]
    if bf16_matmul:
        mm = lambda a, w: jnp.dot(a.astype(jnp.bfloat16), w.astype(jnp.bfloat16),
                                  preferred_element_type=jnp.float32)
    else:
        mm = lambda a, w: jnp.dot(a, w)
    h_state = jnp.zeros((d, B, H), jnp.float32)
    c_state = jnp.zeros((d, B, H), jnp.float32)
    outs = []
    for t in range(T):
        slot = t % d
        h_prev, c_prev = h_state[slot], c_state[slot]
        g = (mm(x[t], wx) + b) + mm(h_prev, wh)       # same add order as kernel
        i_g = jax.nn.sigmoid(g[:, :H])
        f_g = jax.nn.sigmoid(g[:, H:2 * H])
        g_g = jnp.tanh(g[:, 2 * H:3 * H])
        o_g = jax.nn.sigmoid(g[:, 3 * H:])
        c_t = f_g * c_prev + i_g * g_g
        h_t = o_g * jnp.tanh(c_t)
        h_state = h_state.at[slot].set(h_t)
        c_state = c_state.at[slot].set(c_t)
        outs.append(h_t)
    return jnp.stack(outs)


def residual_drnn_ref(input_data, params, config, bf16_matmul=False):
    out = None
    for layer_num, dil_group in enumerate(config['dilations']):
        residual = input_data
        h = input_data
        for cell_idx, d in enumerate(dil_group):
            wx, wh, b = params[layer_num][cell_idx]
            h = _dilated_lstm_ref(h, wx, wh, b, d, bf16_matmul)
        out = h
        if layer_num > 0:
            out = out + residual
        input_data = out
    return out


if __name__ == "__main__":
    def check(config, T, B):
        F0 = config['input_size'] + config['num_of_categories']
        key = jax.random.PRNGKey(0)
        key, xk = jax.random.split(key)
        x = jax.random.normal(xk, (T, B, F0), jnp.float32)
        params = init_residual_drnn_params(key, config)

        out = jax.block_until_ready(residual_drnn_forward(x, params, config))
        assert out.shape == (T, B, config['state_hsize'])

        # Strict check vs. a reference using identical bf16-operand matmuls
        # (verifies the fused kernel's re-batching / residual / gate logic).
        ref_b16 = jax.block_until_ready(
            residual_drnn_ref(x, params, config, bf16_matmul=True))
        np.testing.assert_allclose(np.asarray(out), np.asarray(ref_b16),
                                   rtol=5e-3, atol=5e-3)
        # Looser check vs. the full-f32 (PyTorch-semantics) reference; the only
        # deviation is bf16 rounding of the MXU operands.
        ref_f32 = jax.block_until_ready(
            residual_drnn_ref(x, params, config, bf16_matmul=False))
        np.testing.assert_allclose(np.asarray(out), np.asarray(ref_f32),
                                   rtol=3e-2, atol=3e-2)

    # Config 1: the ES-RNN-style config (all dilations divide T).
    cfg1 = {
        'input_size': 4,
        'num_of_categories': 6,
        'state_hsize': 32,
        'dilations': ((1, 2), (2, 4)),
        'rnn_cell_type': 'LSTM',
    }
    check(cfg1, T=8, B=2)

    # Config 2: dilations that do NOT divide T — exercises the tail-padding
    # (t_pad > T) path flagged in the review.
    cfg2 = {
        'input_size': 4,
        'num_of_categories': 6,
        'state_hsize': 32,
        'dilations': ((1, 3), (5,)),
        'rnn_cell_type': 'LSTM',
    }
    check(cfg2, T=8, B=2)

    print("KERNEL_OK")
</pallas_src>

<mosaic_0001>
module attributes {stable_mosaic.version = 11 : i64} {
  func.func @_drnn_stack_kernel(%arg0: memref<16x10xf32, #tpu.memory_space<vmem>>, %arg1: memref<10x128xbf16, #tpu.memory_space<vmem>>, %arg2: memref<3x32x128xbf16, #tpu.memory_space<vmem>>, %arg3: memref<4x32x128xbf16, #tpu.memory_space<vmem>>, %arg4: memref<4x1x128xf32, #tpu.memory_space<vmem>>, %arg5: memref<16x32xf32, #tpu.memory_space<vmem>>, %arg6: memref<16x128xf32, #tpu.memory_space<vmem>>, %arg7: memref<16x32xf32, #tpu.memory_space<vmem>>) attributes {dimension_semantics = [], scalar_prefetch = 0 : i64, scratch_operands = 2 : i64, tpu.core_type = #tpu.core_type<tc>} {
    %c0 = arith.constant 0 : index
    %c0_0 = arith.constant 0 : index
    %0 = vector.load %arg0[%c0, %c0_0] : memref<16x10xf32, #tpu.memory_space<vmem>>, vector<16x10xf32>
    %c0_1 = arith.constant 0 : index
    %c0_2 = arith.constant 0 : index
    %1 = vector.load %arg1[%c0_1, %c0_2] : memref<10x128xbf16, #tpu.memory_space<vmem>>, vector<10x128xbf16>
    %c0_3 = arith.constant 0 : index
    %c0_4 = arith.constant 0 : index
    %c0_5 = arith.constant 0 : index
    %2 = vector.load %arg3[%c0_3, %c0_4, %c0_5] : memref<4x32x128xbf16, #tpu.memory_space<vmem>>, vector<1x32x128xbf16>
    %3 = vector.shape_cast %2 : vector<1x32x128xbf16> to vector<32x128xbf16>
    %c0_6 = arith.constant 0 : index
    %c0_7 = arith.constant 0 : index
    %c0_8 = arith.constant 0 : index
    %4 = vector.load %arg4[%c0_6, %c0_7, %c0_8] : memref<4x1x128xf32, #tpu.memory_space<vmem>>, vector<1x1x128xf32>
    %5 = vector.shape_cast %4 : vector<1x1x128xf32> to vector<1x128xf32>
    %6 = arith.truncf %0 : vector<16x10xf32> to vector<16x10xbf16>
    %cst = arith.constant dense<0.000000e+00> : vector<16x128xf32>
    %7 = tpu.matmul %6, %1, %cst {dimension_numbers = #tpu.dot_dimension_numbers<[1], [0], [0], [1], [0, 0, 1, 1], [], []>} : vector<16x10xbf16>, vector<10x128xbf16>, vector<16x128xf32> -> vector<16x128xf32>
    %8 = vector.broadcast %5 : vector<1x128xf32> to vector<16x128xf32>
    %9 = arith.addf %7, %8 : vector<16x128xf32>
    %c0_9 = arith.constant 0 : index
    %c0_10 = arith.constant 0 : index
    %10 = vector.load %arg6[%c0_9, %c0_10] : memref<16x128xf32, #tpu.memory_space<vmem>>, vector<16x128xf32>
    tpu.vector_store %arg6[%c0_9, %c0_10], %9 {strides = array<i32>} : memref<16x128xf32, #tpu.memory_space<vmem>>, vector<16x128xf32>,
    %cst_11 = arith.constant 0.000000e+00 : f32
    %11 = vector.broadcast %cst_11 : f32 to vector<2x32xf32>
    %cst_12 = arith.constant 0.000000e+00 : f32
    %12 = vector.broadcast %cst_12 : f32 to vector<2x32xf32>
    %c0_13 = arith.constant 0 : index
    %c0_14 = arith.constant 0 : index
    %13 = vector.load %arg6[%c0_13, %c0_14] : memref<16x128xf32, #tpu.memory_space<vmem>>, vector<2x128xf32>
    %14 = arith.truncf %11 : vector<2x32xf32> to vector<2x32xbf16>
    %cst_15 = arith.constant dense<0.000000e+00> : vector<2x128xf32>
    %15 = tpu.matmul %14, %3, %cst_15 {dimension_numbers = #tpu.dot_dimension_numbers<[1], [0], [0], [1], [0, 0, 1, 1], [], []>} : vector<2x32xbf16>, vector<32x128xbf16>, vector<2x128xf32> -> vector<2x128xf32>
    %16 = arith.addf %13, %15 : vector<2x128xf32>
    %17 = arith.negf %16 : vector<2x128xf32>
    %18 = math.exp %17 : vector<2x128xf32>
    %cst_16 = arith.constant 1.000000e+00 : f32
    %19 = vector.broadcast %cst_16 : f32 to vector<2x128xf32>
    %20 = arith.addf %19, %18 : vector<2x128xf32>
    %21 = arith.divf %19, %20 : vector<2x128xf32>
    %22 = math.tanh %16 : vector<2x128xf32>
    %23 = vector.extract_strided_slice %21 {offsets = [0, 0], sizes = [2, 32], strides = [1, 1]} : vector<2x128xf32> to vector<2x32xf32>
    %24 = vector.extract_strided_slice %21 {offsets = [0, 32], sizes = [2, 32], strides = [1, 1]} : vector<2x128xf32> to vector<2x32xf32>
    %25 = vector.extract_strided_slice %22 {offsets = [0, 64], sizes = [2, 32], strides = [1, 1]} : vector<2x128xf32> to vector<2x32xf32>
    %26 = vector.extract_strided_slice %21 {offsets = [0, 96], sizes = [2, 32], strides = [1, 1]} : vector<2x128xf32> to vector<2x32xf32>
    %27 = arith.mulf %24, %12 : vector<2x32xf32>
    %28 = arith.mulf %23, %25 : vector<2x32xf32>
    %29 = arith.addf %27, %28 : vector<2x32xf32>
    %30 = math.tanh %29 : vector<2x32xf32>
    %31 = arith.mulf %26, %30 : vector<2x32xf32>
    %c0_17 = arith.constant 0 : index
    %c0_18 = arith.constant 0 : index
    %32 = vector.load %arg7[%c0_17, %c0_18] : memref<16x32xf32, #tpu.memory_space<vmem>>, vector<2x32xf32>
    tpu.vector_store %arg7[%c0_17, %c0_18], %31 {strides = array<i32>} : memref<16x32xf32, #tpu.memory_space<vmem>>, vector<2x32xf32>,
    %c2 = arith.constant 2 : index
    %c0_19 = arith.constant 0 : index
    %33 = vector.load %arg6[%c2, %c0_19] : memref<16x128xf32, #tpu.memory_space<vmem>>, vector<2x128xf32>
    %34 = arith.truncf %31 : vector<2x32xf32> to vector<2x32xbf16>
    %cst_20 = arith.constant dense<0.000000e+00> : vector<2x128xf32>
    %35 = tpu.matmul %34, %3, %cst_20 {dimension_numbers = #tpu.dot_dimension_numbers<[1], [0], [0], [1], [0, 0, 1, 1], [], []>} : vector<2x32xbf16>, vector<32x128xbf16>, vector<2x128xf32> -> vector<2x128xf32>
    %36 = arith.addf %33, %35 : vector<2x128xf32>
    %37 = arith.negf %36 : vector<2x128xf32>
    %38 = math.exp %37 : vector<2x128xf32>
    %cst_21 = arith.constant 1.000000e+00 : f32
    %39 = vector.broadcast %cst_21 : f32 to vector<2x128xf32>
    %40 = arith.addf %39, %38 : vector<2x128xf32>
    %41 = arith.divf %39, %40 : vector<2x128xf32>
    %42 = math.tanh %36 : vector<2x128xf32>
    %43 = vector.extract_strided_slice %41 {offsets = [0, 0], sizes = [2, 32], strides = [1, 1]} : vector<2x128xf32> to vector<2x32xf32>
    %44 = vector.extract_strided_slice %41 {offsets = [0, 32], sizes = [2, 32], strides = [1, 1]} : vector<2x128xf32> to vector<2x32xf32>
    %45 = vector.extract_strided_slice %42 {offsets = [0, 64], sizes = [2, 32], strides = [1, 1]} : vector<2x128xf32> to vector<2x32xf32>
    %46 = vector.extract_strided_slice %41 {offsets = [0, 96], sizes = [2, 32], strides = [1, 1]} : vector<2x128xf32> to vector<2x32xf32>
    %47 = arith.mulf %44, %29 : vector<2x32xf32>
    %48 = arith.mulf %43, %45 : vector<2x32xf32>
    %49 = arith.addf %47, %48 : vector<2x32xf32>
    %50 = math.tanh %49 : vector<2x32xf32>
    %51 = arith.mulf %46, %50 : vector<2x32xf32>
    %c2_22 = arith.constant 2 : index
    %c0_23 = arith.constant 0 : index
    %52 = vector.load %arg7[%c2_22, %c0_23] : memref<16x32xf32, #tpu.memory_space<vmem>>, vector<2x32xf32>
    tpu.vector_store %arg7[%c2_22, %c0_23], %51 {strides = array<i32>} : memref<16x32xf32, #tpu.memory_space<vmem>>, vector<2x32xf32>,
    %c4 = arith.constant 4 : index
    %c0_24 = arith.constant 0 : index
    %53 = vector.load %arg6[%c4, %c0_24] : memref<16x128xf32, #tpu.memory_space<vmem>>, vector<2x128xf32>
    %54 = arith.truncf %51 : vector<2x32xf32> to vector<2x32xbf16>
    %cst_25 = arith.constant dense<0.000000e+00> : vector<2x128xf32>
    %55 = tpu.matmul %54, %3, %cst_25 {dimension_numbers = #tpu.dot_dimension_numbers<[1], [0], [0], [1], [0, 0, 1, 1], [], []>} : vector<2x32xbf16>, vector<32x128xbf16>, vector<2x128xf32> -> vector<2x128xf32>
    %56 = arith.addf %53, %55 : vector<2x128xf32>
    %57 = arith.negf %56 : vector<2x128xf32>
    %58 = math.exp %57 : vector<2x128xf32>
    %cst_26 = arith.constant 1.000000e+00 : f32
    %59 = vector.broadcast %cst_26 : f32 to vector<2x128xf32>
    %60 = arith.addf %59, %58 : vector<2x128xf32>
    %61 = arith.divf %59, %60 : vector<2x128xf32>
    %62 = math.tanh %56 : vector<2x128xf32>
    %63 = vector.extract_strided_slice %61 {offsets = [0, 0], sizes = [2, 32], strides = [1, 1]} : vector<2x128xf32> to vector<2x32xf32>
    %64 = vector.extract_strided_slice %61 {offsets = [0, 32], sizes = [2, 32], strides = [1, 1]} : vector<2x128xf32> to vector<2x32xf32>
    %65 = vector.extract_strided_slice %62 {offsets = [0, 64], sizes = [2, 32], strides = [1, 1]} : vector<2x128xf32> to vector<2x32xf32>
    %66 = vector.extract_strided_slice %61 {offsets = [0, 96], sizes = [2, 32], strides = [1, 1]} : vector<2x128xf32> to vector<2x32xf32>
    %67 = arith.mulf %64, %49 : vector<2x32xf32>
    %68 = arith.mulf %63, %65 : vector<2x32xf32>
    %69 = arith.addf %67, %68 : vector<2x32xf32>
    %70 = math.tanh %69 : vector<2x32xf32>
    %71 = arith.mulf %66, %70 : vector<2x32xf32>
    %c4_27 = arith.constant 4 : index
    %c0_28 = arith.constant 0 : index
    %72 = vector.load %arg7[%c4_27, %c0_28] : memref<16x32xf32, #tpu.memory_space<vmem>>, vector<2x32xf32>
    tpu.vector_store %arg7[%c4_27, %c0_28], %71 {strides = array<i32>} : memref<16x32xf32, #tpu.memory_space<vmem>>, vector<2x32xf32>,
    %c6 = arith.constant 6 : index
    %c0_29 = arith.constant 0 : index
    %73 = vector.load %arg6[%c6, %c0_29] : memref<16x128xf32, #tpu.memory_space<vmem>>, vector<2x128xf32>
    %74 = arith.truncf %71 : vector<2x32xf32> to vector<2x32xbf16>
    %cst_30 = arith.constant dense<0.000000e+00> : vector<2x128xf32>
    %75 = tpu.matmul %74, %3, %cst_30 {dimension_numbers = #tpu.dot_dimension_numbers<[1], [0], [0], [1], [0, 0, 1, 1], [], []>} : vector<2x32xbf16>, vector<32x128xbf16>, vector<2x128xf32> -> vector<2x128xf32>
    %76 = arith.addf %73, %75 : vector<2x128xf32>
    %77 = arith.negf %76 : vector<2x128xf32>
    %78 = math.exp %77 : vector<2x128xf32>
    %cst_31 = arith.constant 1.000000e+00 : f32
    %79 = vector.broadcast %cst_31 : f32 to vector<2x128xf32>
    %80 = arith.addf %79, %78 : vector<2x128xf32>
    %81 = arith.divf %79, %80 : vector<2x128xf32>
    %82 = math.tanh %76 : vector<2x128xf32>
    %83 = vector.extract_strided_slice %81 {offsets = [0, 0], sizes = [2, 32], strides = [1, 1]} : vector<2x128xf32> to vector<2x32xf32>
    %84 = vector.extract_strided_slice %81 {offsets = [0, 32], sizes = [2, 32], strides = [1, 1]} : vector<2x128xf32> to vector<2x32xf32>
    %85 = vector.extract_strided_slice %82 {offsets = [0, 64], sizes = [2, 32], strides = [1, 1]} : vector<2x128xf32> to vector<2x32xf32>
    %86 = vector.extract_strided_slice %81 {offsets = [0, 96], sizes = [2, 32], strides = [1, 1]} : vector<2x128xf32> to vector<2x32xf32>
    %87 = arith.mulf %84, %69 : vector<2x32xf32>
    %88 = arith.mulf %83, %85 : vector<2x32xf32>
    %89 = arith.addf %87, %88 : vector<2x32xf32>
    %90 = math.tanh %89 : vector<2x32xf32>
    %91 = arith.mulf %86, %90 : vector<2x32xf32>
    %c6_32 = arith.constant 6 : index
    %c0_33 = arith.constant 0 : index
    %92 = vector.load %arg7[%c6_32, %c0_33] : memref<16x32xf32, #tpu.memory_space<vmem>>, vector<2x32xf32>
    tpu.vector_store %arg7[%c6_32, %c0_33], %91 {strides = array<i32>} : memref<16x32xf32, #tpu.memory_space<vmem>>, vector<2x32xf32>,
    %c8 = arith.constant 8 : index
    %c0_34 = arith.constant 0 : index
    %93 = vector.load %arg6[%c8, %c0_34] : memref<16x128xf32, #tpu.memory_space<vmem>>, vector<2x128xf32>
    %94 = arith.truncf %91 : vector<2x32xf32> to vector<2x32xbf16>
    %cst_35 = arith.constant dense<0.000000e+00> : vector<2x128xf32>
    %95 = tpu.matmul %94, %3, %cst_35 {dimension_numbers = #tpu.dot_dimension_numbers<[1], [0], [0], [1], [0, 0, 1, 1], [], []>} : vector<2x32xbf16>, vector<32x128xbf16>, vector<2x128xf32> -> vector<2x128xf32>
    %96 = arith.addf %93, %95 : vector<2x128xf32>
    %97 = arith.negf %96 : vector<2x128xf32>
    %98 = math.exp %97 : vector<2x128xf32>
    %cst_36 = arith.constant 1.000000e+00 : f32
    %99 = vector.broadcast %cst_36 : f32 to vector<2x128xf32>
    %100 = arith.addf %99, %98 : vector<2x128xf32>
    %101 = arith.divf %99, %100 : vector<2x128xf32>
    %102 = math.tanh %96 : vector<2x128xf32>
    %103 = vector.extract_strided_slice %101 {offsets = [0, 0], sizes = [2, 32], strides = [1, 1]} : vector<2x128xf32> to vector<2x32xf32>
    %104 = vector.extract_strided_slice %101 {offsets = [0, 32], sizes = [2, 32], strides = [1, 1]} : vector<2x128xf32> to vector<2x32xf32>
    %105 = vector.extract_strided_slice %102 {offsets = [0, 64], sizes = [2, 32], strides = [1, 1]} : vector<2x128xf32> to vector<2x32xf32>
    %106 = vector.extract_strided_slice %101 {offsets = [0, 96], sizes = [2, 32], strides = [1, 1]} : vector<2x128xf32> to vector<2x32xf32>
    %107 = arith.mulf %104, %89 : vector<2x32xf32>
    %108 = arith.mulf %103, %105 : vector<2x32xf32>
    %109 = arith.addf %107, %108 : vector<2x32xf32>
    %110 = math.tanh %109 : vector<2x32xf32>
    %111 = arith.mulf %106, %110 : vector<2x32xf32>
    %c8_37 = arith.constant 8 : index
    %c0_38 = arith.constant 0 : index
    %112 = vector.load %arg7[%c8_37, %c0_38] : memref<16x32xf32, #tpu.memory_space<vmem>>, vector<2x32xf32>
    tpu.vector_store %arg7[%c8_37, %c0_38], %111 {strides = array<i32>} : memref<16x32xf32, #tpu.memory_space<vmem>>, vector<2x32xf32>,
    %c10 = arith.constant 10 : index
    %c0_39 = arith.constant 0 : index
    %113 = vector.load %arg6[%c10, %c0_39] : memref<16x128xf32, #tpu.memory_space<vmem>>, vector<2x128xf32>
    %114 = arith.truncf %111 : vector<2x32xf32> to vector<2x32xbf16>
    %cst_40 = arith.constant dense<0.000000e+00> : vector<2x128xf32>
    %115 = tpu.matmul %114, %3, %cst_40 {dimension_numbers = #tpu.dot_dimension_numbers<[1], [0], [0], [1], [0, 0, 1, 1], [], []>} : vector<2x32xbf16>, vector<32x128xbf16>, vector<2x128xf32> -> vector<2x128xf32>
    %116 = arith.addf %113, %115 : vector<2x128xf32>
    %117 = arith.negf %116 : vector<2x128xf32>
    %118 = math.exp %117 : vector<2x128xf32>
    %cst_41 = arith.constant 1.000000e+00 : f32
    %119 = vector.broadcast %cst_41 : f32 to vector<2x128xf32>
    %120 = arith.addf %119, %118 : vector<2x128xf32>
    %121 = arith.divf %119, %120 : vector<2x128xf32>
    %122 = math.tanh %116 : vector<2x128xf32>
    %123 = vector.extract_strided_slice %121 {offsets = [0, 0], sizes = [2, 32], strides = [1, 1]} : vector<2x128xf32> to vector<2x32xf32>
    %124 = vector.extract_strided_slice %121 {offsets = [0, 32], sizes = [2, 32], strides = [1, 1]} : vector<2x128xf32> to vector<2x32xf32>
    %125 = vector.extract_strided_slice %122 {offsets = [0, 64], sizes = [2, 32], strides = [1, 1]} : vector<2x128xf32> to vector<2x32xf32>
    %126 = vector.extract_strided_slice %121 {offsets = [0, 96], sizes = [2, 32], strides = [1, 1]} : vector<2x128xf32> to vector<2x32xf32>
    %127 = arith.mulf %124, %109 : vector<2x32xf32>
    %128 = arith.mulf %123, %125 : vector<2x32xf32>
    %129 = arith.addf %127, %128 : vector<2x32xf32>
    %130 = math.tanh %129 : vector<2x32xf32>
    %131 = arith.mulf %126, %130 : vector<2x32xf32>
    %c10_42 = arith.constant 10 : index
    %c0_43 = arith.constant 0 : index
    %132 = vector.load %arg7[%c10_42, %c0_43] : memref<16x32xf32, #tpu.memory_space<vmem>>, vector<2x32xf32>
    tpu.vector_store %arg7[%c10_42, %c0_43], %131 {strides = array<i32>} : memref<16x32xf32, #tpu.memory_space<vmem>>, vector<2x32xf32>,
    %c12 = arith.constant 12 : index
    %c0_44 = arith.constant 0 : index
    %133 = vector.load %arg6[%c12, %c0_44] : memref<16x128xf32, #tpu.memory_space<vmem>>, vector<2x128xf32>
    %134 = arith.truncf %131 : vector<2x32xf32> to vector<2x32xbf16>
    %cst_45 = arith.constant dense<0.000000e+00> : vector<2x128xf32>
    %135 = tpu.matmul %134, %3, %cst_45 {dimension_numbers = #tpu.dot_dimension_numbers<[1], [0], [0], [1], [0, 0, 1, 1], [], []>} : vector<2x32xbf16>, vector<32x128xbf16>, vector<2x128xf32> -> vector<2x128xf32>
    %136 = arith.addf %133, %135 : vector<2x128xf32>
    %137 = arith.negf %136 : vector<2x128xf32>
    %138 = math.exp %137 : vector<2x128xf32>
    %cst_46 = arith.constant 1.000000e+00 : f32
    %139 = vector.broadcast %cst_46 : f32 to vector<2x128xf32>
    %140 = arith.addf %139, %138 : vector<2x128xf32>
    %141 = arith.divf %139, %140 : vector<2x128xf32>
    %142 = math.tanh %136 : vector<2x128xf32>
    %143 = vector.extract_strided_slice %141 {offsets = [0, 0], sizes = [2, 32], strides = [1, 1]} : vector<2x128xf32> to vector<2x32xf32>
    %144 = vector.extract_strided_slice %141 {offsets = [0, 32], sizes = [2, 32], strides = [1, 1]} : vector<2x128xf32> to vector<2x32xf32>
    %145 = vector.extract_strided_slice %142 {offsets = [0, 64], sizes = [2, 32], strides = [1, 1]} : vector<2x128xf32> to vector<2x32xf32>
    %146 = vector.extract_strided_slice %141 {offsets = [0, 96], sizes = [2, 32], strides = [1, 1]} : vector<2x128xf32> to vector<2x32xf32>
    %147 = arith.mulf %144, %129 : vector<2x32xf32>
    %148 = arith.mulf %143, %145 : vector<2x32xf32>
    %149 = arith.addf %147, %148 : vector<2x32xf32>
    %150 = math.tanh %149 : vector<2x32xf32>
    %151 = arith.mulf %146, %150 : vector<2x32xf32>
    %c12_47 = arith.constant 12 : index
    %c0_48 = arith.constant 0 : index
    %152 = vector.load %arg7[%c12_47, %c0_48] : memref<16x32xf32, #tpu.memory_space<vmem>>, vector<2x32xf32>
    tpu.vector_store %arg7[%c12_47, %c0_48], %151 {strides = array<i32>} : memref<16x32xf32, #tpu.memory_space<vmem>>, vector<2x32xf32>,
    %c14 = arith.constant 14 : index
    %c0_49 = arith.constant 0 : index
    %153 = vector.load %arg6[%c14, %c0_49] : memref<16x128xf32, #tpu.memory_space<vmem>>, vector<2x128xf32>
    %154 = arith.truncf %151 : vector<2x32xf32> to vector<2x32xbf16>
    %cst_50 = arith.constant dense<0.000000e+00> : vector<2x128xf32>
    %155 = tpu.matmul %154, %3, %cst_50 {dimension_numbers = #tpu.dot_dimension_numbers<[1], [0], [0], [1], [0, 0, 1, 1], [], []>} : vector<2x32xbf16>, vector<32x128xbf16>, vector<2x128xf32> -> vector<2x128xf32>
    %156 = arith.addf %153, %155 : vector<2x128xf32>
    %157 = arith.negf %156 : vector<2x128xf32>
    %158 = math.exp %157 : vector<2x128xf32>
    %cst_51 = arith.constant 1.000000e+00 : f32
    %159 = vector.broadcast %cst_51 : f32 to vector<2x128xf32>
    %160 = arith.addf %159, %158 : vector<2x128xf32>
    %161 = arith.divf %159, %160 : vector<2x128xf32>
    %162 = math.tanh %156 : vector<2x128xf32>
    %163 = vector.extract_strided_slice %161 {offsets = [0, 0], sizes = [2, 32], strides = [1, 1]} : vector<2x128xf32> to vector<2x32xf32>
    %164 = vector.extract_strided_slice %161 {offsets = [0, 32], sizes = [2, 32], strides = [1, 1]} : vector<2x128xf32> to vector<2x32xf32>
    %165 = vector.extract_strided_slice %162 {offsets = [0, 64], sizes = [2, 32], strides = [1, 1]} : vector<2x128xf32> to vector<2x32xf32>
    %166 = vector.extract_strided_slice %161 {offsets = [0, 96], sizes = [2, 32], strides = [1, 1]} : vector<2x128xf32> to vector<2x32xf32>
    %167 = arith.mulf %164, %149 : vector<2x32xf32>
    %168 = arith.mulf %163, %165 : vector<2x32xf32>
    %169 = arith.addf %167, %168 : vector<2x32xf32>
    %170 = math.tanh %169 : vector<2x32xf32>
    %171 = arith.mulf %166, %170 : vector<2x32xf32>
    %c14_52 = arith.constant 14 : index
    %c0_53 = arith.constant 0 : index
    %172 = vector.load %arg7[%c14_52, %c0_53] : memref<16x32xf32, #tpu.memory_space<vmem>>, vector<2x32xf32>
    tpu.vector_store %arg7[%c14_52, %c0_53], %171 {strides = array<i32>} : memref<16x32xf32, #tpu.memory_space<vmem>>, vector<2x32xf32>,
    %c0_54 = arith.constant 0 : index
    %c0_55 = arith.constant 0 : index
    %173 = vector.load %arg7[%c0_54, %c0_55] : memref<16x32xf32, #tpu.memory_space<vmem>>, vector<16x32xf32>
    %c0_56 = arith.constant 0 : index
    %c0_57 = arith.constant 0 : index
    %c0_58 = arith.constant 0 : index
    %174 = vector.load %arg2[%c0_56, %c0_57, %c0_58] : memref<3x32x128xbf16, #tpu.memory_space<vmem>>, vector<1x32x128xbf16>
    %175 = vector.shape_cast %174 : vector<1x32x128xbf16> to vector<32x128xbf16>
    %c1 = arith.constant 1 : index
    %c0_59 = arith.constant 0 : index
    %c0_60 = arith.constant 0 : index
    %176 = vector.load %arg3[%c1, %c0_59, %c0_60] : memref<4x32x128xbf16, #tpu.memory_space<vmem>>, vector<1x32x128xbf16>
    %177 = vector.shape_cast %176 : vector<1x32x128xbf16> to vector<32x128xbf16>
    %c1_61 = arith.constant 1 : index
    %c0_62 = arith.constant 0 : index
    %c0_63 = arith.constant 0 : index
    %178 = vector.load %arg4[%c1_61, %c0_62, %c0_63] : memref<4x1x128xf32, #tpu.memory_space<vmem>>, vector<1x1x128xf32>
    %179 = vector.shape_cast %178 : vector<1x1x128xf32> to vector<1x128xf32>
    %180 = arith.truncf %173 : vector<16x32xf32> to vector<16x32xbf16>
    %cst_64 = arith.constant dense<0.000000e+00> : vector<16x128xf32>
    %181 = tpu.matmul %180, %175, %cst_64 {dimension_numbers = #tpu.dot_dimension_numbers<[1], [0], [0], [1], [0, 0, 1, 1], [], []>} : vector<16x32xbf16>, vector<32x128xbf16>, vector<16x128xf32> -> vector<16x128xf32>
    %182 = vector.broadcast %179 : vector<1x128xf32> to vector<16x128xf32>
    %183 = arith.addf %181, %182 : vector<16x128xf32>
    %c0_65 = arith.constant 0 : index
    %c0_66 = arith.constant 0 : index
    %184 = vector.load %arg6[%c0_65, %c0_66] : memref<16x128xf32, #tpu.memory_space<vmem>>, vector<16x128xf32>
    tpu.vector_store %arg6[%c0_65, %c0_66], %183 {strides = array<i32>} : memref<16x128xf32, #tpu.memory_space<vmem>>, vector<16x128xf32>,
    %cst_67 = arith.constant 0.000000e+00 : f32
    %185 = vector.broadcast %cst_67 : f32 to vector<4x32xf32>
    %cst_68 = arith.constant 0.000000e+00 : f32
    %186 = vector.broadcast %cst_68 : f32 to vector<4x32xf32>
    %c0_69 = arith.constant 0 : index
    %c0_70 = arith.constant 0 : index
    %187 = vector.load %arg6[%c0_69, %c0_70] : memref<16x128xf32, #tpu.memory_space<vmem>>, vector<4x128xf32>
    %188 = arith.truncf %185 : vector<4x32xf32> to vector<4x32xbf16>
    %cst_71 = arith.constant dense<0.000000e+00> : vector<4x128xf32>
    %189 = tpu.matmul %188, %177, %cst_71 {dimension_numbers = #tpu.dot_dimension_numbers<[1], [0], [0], [1], [0, 0, 1, 1], [], []>} : vector<4x32xbf16>, vector<32x128xbf16>, vector<4x128xf32> -> vector<4x128xf32>
    %190 = arith.addf %187, %189 : vector<4x128xf32>
    %191 = arith.negf %190 : vector<4x128xf32>
    %192 = math.exp %191 : vector<4x128xf32>
    %cst_72 = arith.constant 1.000000e+00 : f32
    %193 = vector.broadcast %cst_72 : f32 to vector<4x128xf32>
    %194 = arith.addf %193, %192 : vector<4x128xf32>
    %195 = arith.divf %193, %194 : vector<4x128xf32>
    %196 = math.tanh %190 : vector<4x128xf32>
    %197 = vector.extract_strided_slice %195 {offsets = [0, 0], sizes = [4, 32], strides = [1, 1]} : vector<4x128xf32> to vector<4x32xf32>
    %198 = vector.extract_strided_slice %195 {offsets = [0, 32], sizes = [4, 32], strides = [1, 1]} : vector<4x128xf32> to vector<4x32xf32>
    %199 = vector.extract_strided_slice %196 {offsets = [0, 64], sizes = [4, 32], strides = [1, 1]} : vector<4x128xf32> to vector<4x32xf32>
    %200 = vector.extract_strided_slice %195 {offsets = [0, 96], sizes = [4, 32], strides = [1, 1]} : vector<4x128xf32> to vector<4x32xf32>
    %201 = arith.mulf %198, %186 : vector<4x32xf32>
    %202 = arith.mulf %197, %199 : vector<4x32xf32>
    %203 = arith.addf %201, %202 : vector<4x32xf32>
    %204 = math.tanh %203 : vector<4x32xf32>
    %205 = arith.mulf %200, %204 : vector<4x32xf32>
    %c0_73 = arith.constant 0 : index
    %c0_74 = arith.constant 0 : index
    %206 = vector.load %arg7[%c0_73, %c0_74] : memref<16x32xf32, #tpu.memory_space<vmem>>, vector<4x32xf32>
    tpu.vector_store %arg7[%c0_73, %c0_74], %205 {strides = array<i32>} : memref<16x32xf32, #tpu.memory_space<vmem>>, vector<4x32xf32>,
    %c4_75 = arith.constant 4 : index
    %c0_76 = arith.constant 0 : index
    %207 = vector.load %arg6[%c4_75, %c0_76] : memref<16x128xf32, #tpu.memory_space<vmem>>, vector<4x128xf32>
    %208 = arith.truncf %205 : vector<4x32xf32> to vector<4x32xbf16>
    %cst_77 = arith.constant dense<0.000000e+00> : vector<4x128xf32>
    %209 = tpu.matmul %208, %177, %cst_77 {dimension_numbers = #tpu.dot_dimension_numbers<[1], [0], [0], [1], [0, 0, 1, 1], [], []>} : vector<4x32xbf16>, vector<32x128xbf16>, vector<4x128xf32> -> vector<4x128xf32>
    %210 = arith.addf %207, %209 : vector<4x128xf32>
    %211 = arith.negf %210 : vector<4x128xf32>
    %212 = math.exp %211 : vector<4x128xf32>
    %cst_78 = arith.constant 1.000000e+00 : f32
    %213 = vector.broadcast %cst_78 : f32 to vector<4x128xf32>
    %214 = arith.addf %213, %212 : vector<4x128xf32>
    %215 = arith.divf %213, %214 : vector<4x128xf32>
    %216 = math.tanh %210 : vector<4x128xf32>
    %217 = vector.extract_strided_slice %215 {offsets = [0, 0], sizes = [4, 32], strides = [1, 1]} : vector<4x128xf32> to vector<4x32xf32>
    %218 = vector.extract_strided_slice %215 {offsets = [0, 32], sizes = [4, 32], strides = [1, 1]} : vector<4x128xf32> to vector<4x32xf32>
    %219 = vector.extract_strided_slice %216 {offsets = [0, 64], sizes = [4, 32], strides = [1, 1]} : vector<4x128xf32> to vector<4x32xf32>
    %220 = vector.extract_strided_slice %215 {offsets = [0, 96], sizes = [4, 32], strides = [1, 1]} : vector<4x128xf32> to vector<4x32xf32>
    %221 = arith.mulf %218, %203 : vector<4x32xf32>
    %222 = arith.mulf %217, %219 : vector<4x32xf32>
    %223 = arith.addf %221, %222 : vector<4x32xf32>
    %224 = math.tanh %223 : vector<4x32xf32>
    %225 = arith.mulf %220, %224 : vector<4x32xf32>
    %c4_79 = arith.constant 4 : index
    %c0_80 = arith.constant 0 : index
    %226 = vector.load %arg7[%c4_79, %c0_80] : memref<16x32xf32, #tpu.memory_space<vmem>>, vector<4x32xf32>
    tpu.vector_store %arg7[%c4_79, %c0_80], %225 {strides = array<i32>} : memref<16x32xf32, #tpu.memory_space<vmem>>, vector<4x32xf32>,
    %c8_81 = arith.constant 8 : index
    %c0_82 = arith.constant 0 : index
    %227 = vector.load %arg6[%c8_81, %c0_82] : memref<16x128xf32, #tpu.memory_space<vmem>>, vector<4x128xf32>
    %228 = arith.truncf %225 : vector<4x32xf32> to vector<4x32xbf16>
    %cst_83 = arith.constant dense<0.000000e+00> : vector<4x128xf32>
    %229 = tpu.matmul %228, %177, %cst_83 {dimension_numbers = #tpu.dot_dimension_numbers<[1], [0], [0], [1], [0, 0, 1, 1], [], []>} : vector<4x32xbf16>, vector<32x128xbf16>, vector<4x128xf32> -> vector<4x128xf32>
    %230 = arith.addf %227, %229 : vector<4x128xf32>
    %231 = arith.negf %230 : vector<4x128xf32>
    %232 = math.exp %231 : vector<4x128xf32>
    %cst_84 = arith.constant 1.000000e+00 : f32
    %233 = vector.broadcast %cst_84 : f32 to vector<4x128xf32>
    %234 = arith.addf %233, %232 : vector<4x128xf32>
    %235 = arith.divf %233, %234 : vector<4x128xf32>
    %236 = math.tanh %230 : vector<4x128xf32>
    %237 = vector.extract_strided_slice %235 {offsets = [0, 0], sizes = [4, 32], strides = [1, 1]} : vector<4x128xf32> to vector<4x32xf32>
    %238 = vector.extract_strided_slice %235 {offsets = [0, 32], sizes = [4, 32], strides = [1, 1]} : vector<4x128xf32> to vector<4x32xf32>
    %239 = vector.extract_strided_slice %236 {offsets = [0, 64], sizes = [4, 32], strides = [1, 1]} : vector<4x128xf32> to vector<4x32xf32>
    %240 = vector.extract_strided_slice %235 {offsets = [0, 96], sizes = [4, 32], strides = [1, 1]} : vector<4x128xf32> to vector<4x32xf32>
    %241 = arith.mulf %238, %223 : vector<4x32xf32>
    %242 = arith.mulf %237, %239 : vector<4x32xf32>
    %243 = arith.addf %241, %242 : vector<4x32xf32>
    %244 = math.tanh %243 : vector<4x32xf32>
    %245 = arith.mulf %240, %244 : vector<4x32xf32>
    %c8_85 = arith.constant 8 : index
    %c0_86 = arith.constant 0 : index
    %246 = vector.load %arg7[%c8_85, %c0_86] : memref<16x32xf32, #tpu.memory_space<vmem>>, vector<4x32xf32>
    tpu.vector_store %arg7[%c8_85, %c0_86], %245 {strides = array<i32>} : memref<16x32xf32, #tpu.memory_space<vmem>>, vector<4x32xf32>,
    %c12_87 = arith.constant 12 : index
    %c0_88 = arith.constant 0 : index
    %247 = vector.load %arg6[%c12_87, %c0_88] : memref<16x128xf32, #tpu.memory_space<vmem>>, vector<4x128xf32>
    %248 = arith.truncf %245 : vector<4x32xf32> to vector<4x32xbf16>
    %cst_89 = arith.constant dense<0.000000e+00> : vector<4x128xf32>
    %249 = tpu.matmul %248, %177, %cst_89 {dimension_numbers = #tpu.dot_dimension_numbers<[1], [0], [0], [1], [0, 0, 1, 1], [], []>} : vector<4x32xbf16>, vector<32x128xbf16>, vector<4x128xf32> -> vector<4x128xf32>
    %250 = arith.addf %247, %249 : vector<4x128xf32>
    %251 = arith.negf %250 : vector<4x128xf32>
    %252 = math.exp %251 : vector<4x128xf32>
    %cst_90 = arith.constant 1.000000e+00 : f32
    %253 = vector.broadcast %cst_90 : f32 to vector<4x128xf32>
    %254 = arith.addf %253, %252 : vector<4x128xf32>
    %255 = arith.divf %253, %254 : vector<4x128xf32>
    %256 = math.tanh %250 : vector<4x128xf32>
    %257 = vector.extract_strided_slice %255 {offsets = [0, 0], sizes = [4, 32], strides = [1, 1]} : vector<4x128xf32> to vector<4x32xf32>
    %258 = vector.extract_strided_slice %255 {offsets = [0, 32], sizes = [4, 32], strides = [1, 1]} : vector<4x128xf32> to vector<4x32xf32>
    %259 = vector.extract_strided_slice %256 {offsets = [0, 64], sizes = [4, 32], strides = [1, 1]} : vector<4x128xf32> to vector<4x32xf32>
    %260 = vector.extract_strided_slice %255 {offsets = [0, 96], sizes = [4, 32], strides = [1, 1]} : vector<4x128xf32> to vector<4x32xf32>
    %261 = arith.mulf %258, %243 : vector<4x32xf32>
    %262 = arith.mulf %257, %259 : vector<4x32xf32>
    %263 = arith.addf %261, %262 : vector<4x32xf32>
    %264 = math.tanh %263 : vector<4x32xf32>
    %265 = arith.mulf %260, %264 : vector<4x32xf32>
    %c12_91 = arith.constant 12 : index
    %c0_92 = arith.constant 0 : index
    %266 = vector.load %arg7[%c12_91, %c0_92] : memref<16x32xf32, #tpu.memory_space<vmem>>, vector<4x32xf32>
    tpu.vector_store %arg7[%c12_91, %c0_92], %265 {strides = array<i32>} : memref<16x32xf32, #tpu.memory_space<vmem>>, vector<4x32xf32>,
    %c0_93 = arith.constant 0 : index
    %c0_94 = arith.constant 0 : index
    %267 = vector.load %arg7[%c0_93, %c0_94] : memref<16x32xf32, #tpu.memory_space<vmem>>, vector<16x32xf32>
    %c1_95 = arith.constant 1 : index
    %c0_96 = arith.constant 0 : index
    %c0_97 = arith.constant 0 : index
    %268 = vector.load %arg2[%c1_95, %c0_96, %c0_97] : memref<3x32x128xbf16, #tpu.memory_space<vmem>>, vector<1x32x128xbf16>
    %269 = vector.shape_cast %268 : vector<1x32x128xbf16> to vector<32x128xbf16>
    %c2_98 = arith.constant 2 : index
    %c0_99 = arith.constant 0 : index
    %c0_100 = arith.constant 0 : index
    %270 = vector.load %arg3[%c2_98, %c0_99, %c0_100] : memref<4x32x128xbf16, #tpu.memory_space<vmem>>, vector<1x32x128xbf16>
    %271 = vector.shape_cast %270 : vector<1x32x128xbf16> to vector<32x128xbf16>
    %c2_101 = arith.constant 2 : index
    %c0_102 = arith.constant 0 : index
    %c0_103 = arith.constant 0 : index
    %272 = vector.load %arg4[%c2_101, %c0_102, %c0_103] : memref<4x1x128xf32, #tpu.memory_space<vmem>>, vector<1x1x128xf32>
    %273 = vector.shape_cast %272 : vector<1x1x128xf32> to vector<1x128xf32>
    %274 = arith.truncf %267 : vector<16x32xf32> to vector<16x32xbf16>
    %cst_104 = arith.constant dense<0.000000e+00> : vector<16x128xf32>
    %275 = tpu.matmul %274, %269, %cst_104 {dimension_numbers = #tpu.dot_dimension_numbers<[1], [0], [0], [1], [0, 0, 1, 1], [], []>} : vector<16x32xbf16>, vector<32x128xbf16>, vector<16x128xf32> -> vector<16x128xf32>
    %276 = vector.broadcast %273 : vector<1x128xf32> to vector<16x128xf32>
    %277 = arith.addf %275, %276 : vector<16x128xf32>
    %c0_105 = arith.constant 0 : index
    %c0_106 = arith.constant 0 : index
    %278 = vector.load %arg6[%c0_105, %c0_106] : memref<16x128xf32, #tpu.memory_space<vmem>>, vector<16x128xf32>
    tpu.vector_store %arg6[%c0_105, %c0_106], %277 {strides = array<i32>} : memref<16x128xf32, #tpu.memory_space<vmem>>, vector<16x128xf32>,
    %cst_107 = arith.constant 0.000000e+00 : f32
    %279 = vector.broadcast %cst_107 : f32 to vector<4x32xf32>
    %cst_108 = arith.constant 0.000000e+00 : f32
    %280 = vector.broadcast %cst_108 : f32 to vector<4x32xf32>
    %c0_109 = arith.constant 0 : index
    %c0_110 = arith.constant 0 : index
    %281 = vector.load %arg6[%c0_109, %c0_110] : memref<16x128xf32, #tpu.memory_space<vmem>>, vector<4x128xf32>
    %282 = arith.truncf %279 : vector<4x32xf32> to vector<4x32xbf16>
    %cst_111 = arith.constant dense<0.000000e+00> : vector<4x128xf32>
    %283 = tpu.matmul %282, %271, %cst_111 {dimension_numbers = #tpu.dot_dimension_numbers<[1], [0], [0], [1], [0, 0, 1, 1], [], []>} : vector<4x32xbf16>, vector<32x128xbf16>, vector<4x128xf32> -> vector<4x128xf32>
    %284 = arith.addf %281, %283 : vector<4x128xf32>
    %285 = arith.negf %284 : vector<4x128xf32>
    %286 = math.exp %285 : vector<4x128xf32>
    %cst_112 = arith.constant 1.000000e+00 : f32
    %287 = vector.broadcast %cst_112 : f32 to vector<4x128xf32>
    %288 = arith.addf %287, %286 : vector<4x128xf32>
    %289 = arith.divf %287, %288 : vector<4x128xf32>
    %290 = math.tanh %284 : vector<4x128xf32>
    %291 = vector.extract_strided_slice %289 {offsets = [0, 0], sizes = [4, 32], strides = [1, 1]} : vector<4x128xf32> to vector<4x32xf32>
    %292 = vector.extract_strided_slice %289 {offsets = [0, 32], sizes = [4, 32], strides = [1, 1]} : vector<4x128xf32> to vector<4x32xf32>
    %293 = vector.extract_strided_slice %290 {offsets = [0, 64], sizes = [4, 32], strides = [1, 1]} : vector<4x128xf32> to vector<4x32xf32>
    %294 = vector.extract_strided_slice %289 {offsets = [0, 96], sizes = [4, 32], strides = [1, 1]} : vector<4x128xf32> to vector<4x32xf32>
    %295 = arith.mulf %292, %280 : vector<4x32xf32>
    %296 = arith.mulf %291, %293 : vector<4x32xf32>
    %297 = arith.addf %295, %296 : vector<4x32xf32>
    %298 = math.tanh %297 : vector<4x32xf32>
    %299 = arith.mulf %294, %298 : vector<4x32xf32>
    %c0_113 = arith.constant 0 : index
    %c0_114 = arith.constant 0 : index
    %300 = vector.load %arg7[%c0_113, %c0_114] : memref<16x32xf32, #tpu.memory_space<vmem>>, vector<4x32xf32>
    tpu.vector_store %arg7[%c0_113, %c0_114], %299 {strides = array<i32>} : memref<16x32xf32, #tpu.memory_space<vmem>>, vector<4x32xf32>,
    %c4_115 = arith.constant 4 : index
    %c0_116 = arith.constant 0 : index
    %301 = vector.load %arg6[%c4_115, %c0_116] : memref<16x128xf32, #tpu.memory_space<vmem>>, vector<4x128xf32>
    %302 = arith.truncf %299 : vector<4x32xf32> to vector<4x32xbf16>
    %cst_117 = arith.constant dense<0.000000e+00> : vector<4x128xf32>
    %303 = tpu.matmul %302, %271, %cst_117 {dimension_numbers = #tpu.dot_dimension_numbers<[1], [0], [0], [1], [0, 0, 1, 1], [], []>} : vector<4x32xbf16>, vector<32x128xbf16>, vector<4x128xf32> -> vector<4x128xf32>
    %304 = arith.addf %301, %303 : vector<4x128xf32>
    %305 = arith.negf %304 : vector<4x128xf32>
    %306 = math.exp %305 : vector<4x128xf32>
    %cst_118 = arith.constant 1.000000e+00 : f32
    %307 = vector.broadcast %cst_118 : f32 to vector<4x128xf32>
    %308 = arith.addf %307, %306 : vector<4x128xf32>
    %309 = arith.divf %307, %308 : vector<4x128xf32>
    %310 = math.tanh %304 : vector<4x128xf32>
    %311 = vector.extract_strided_slice %309 {offsets = [0, 0], sizes = [4, 32], strides = [1, 1]} : vector<4x128xf32> to vector<4x32xf32>
    %312 = vector.extract_strided_slice %309 {offsets = [0, 32], sizes = [4, 32], strides = [1, 1]} : vector<4x128xf32> to vector<4x32xf32>
    %313 = vector.extract_strided_slice %310 {offsets = [0, 64], sizes = [4, 32], strides = [1, 1]} : vector<4x128xf32> to vector<4x32xf32>
    %314 = vector.extract_strided_slice %309 {offsets = [0, 96], sizes = [4, 32], strides = [1, 1]} : vector<4x128xf32> to vector<4x32xf32>
    %315 = arith.mulf %312, %297 : vector<4x32xf32>
    %316 = arith.mulf %311, %313 : vector<4x32xf32>
    %317 = arith.addf %315, %316 : vector<4x32xf32>
    %318 = math.tanh %317 : vector<4x32xf32>
    %319 = arith.mulf %314, %318 : vector<4x32xf32>
    %c4_119 = arith.constant 4 : index
    %c0_120 = arith.constant 0 : index
    %320 = vector.load %arg7[%c4_119, %c0_120] : memref<16x32xf32, #tpu.memory_space<vmem>>, vector<4x32xf32>
    tpu.vector_store %arg7[%c4_119, %c0_120], %319 {strides = array<i32>} : memref<16x32xf32, #tpu.memory_space<vmem>>, vector<4x32xf32>,
    %c8_121 = arith.constant 8 : index
    %c0_122 = arith.constant 0 : index
    %321 = vector.load %arg6[%c8_121, %c0_122] : memref<16x128xf32, #tpu.memory_space<vmem>>, vector<4x128xf32>
    %322 = arith.truncf %319 : vector<4x32xf32> to vector<4x32xbf16>
    %cst_123 = arith.constant dense<0.000000e+00> : vector<4x128xf32>
    %323 = tpu.matmul %322, %271, %cst_123 {dimension_numbers = #tpu.dot_dimension_numbers<[1], [0], [0], [1], [0, 0, 1, 1], [], []>} : vector<4x32xbf16>, vector<32x128xbf16>, vector<4x128xf32> -> vector<4x128xf32>
    %324 = arith.addf %321, %323 : vector<4x128xf32>
    %325 = arith.negf %324 : vector<4x128xf32>
    %326 = math.exp %325 : vector<4x128xf32>
    %cst_124 = arith.constant 1.000000e+00 : f32
    %327 = vector.broadcast %cst_124 : f32 to vector<4x128xf32>
    %328 = arith.addf %327, %326 : vector<4x128xf32>
    %329 = arith.divf %327, %328 : vector<4x128xf32>
    %330 = math.tanh %324 : vector<4x128xf32>
    %331 = vector.extract_strided_slice %329 {offsets = [0, 0], sizes = [4, 32], strides = [1, 1]} : vector<4x128xf32> to vector<4x32xf32>
    %332 = vector.extract_strided_slice %329 {offsets = [0, 32], sizes = [4, 32], strides = [1, 1]} : vector<4x128xf32> to vector<4x32xf32>
    %333 = vector.extract_strided_slice %330 {offsets = [0, 64], sizes = [4, 32], strides = [1, 1]} : vector<4x128xf32> to vector<4x32xf32>
    %334 = vector.extract_strided_slice %329 {offsets = [0, 96], sizes = [4, 32], strides = [1, 1]} : vector<4x128xf32> to vector<4x32xf32>
    %335 = arith.mulf %332, %317 : vector<4x32xf32>
    %336 = arith.mulf %331, %333 : vector<4x32xf32>
    %337 = arith.addf %335, %336 : vector<4x32xf32>
    %338 = math.tanh %337 : vector<4x32xf32>
    %339 = arith.mulf %334, %338 : vector<4x32xf32>
    %c8_125 = arith.constant 8 : index
    %c0_126 = arith.constant 0 : index
    %340 = vector.load %arg7[%c8_125, %c0_126] : memref<16x32xf32, #tpu.memory_space<vmem>>, vector<4x32xf32>
    tpu.vector_store %arg7[%c8_125, %c0_126], %339 {strides = array<i32>} : memref<16x32xf32, #tpu.memory_space<vmem>>, vector<4x32xf32>,
    %c12_127 = arith.constant 12 : index
    %c0_128 = arith.constant 0 : index
    %341 = vector.load %arg6[%c12_127, %c0_128] : memref<16x128xf32, #tpu.memory_space<vmem>>, vector<4x128xf32>
    %342 = arith.truncf %339 : vector<4x32xf32> to vector<4x32xbf16>
    %cst_129 = arith.constant dense<0.000000e+00> : vector<4x128xf32>
    %343 = tpu.matmul %342, %271, %cst_129 {dimension_numbers = #tpu.dot_dimension_numbers<[1], [0], [0], [1], [0, 0, 1, 1], [], []>} : vector<4x32xbf16>, vector<32x128xbf16>, vector<4x128xf32> -> vector<4x128xf32>
    %344 = arith.addf %341, %343 : vector<4x128xf32>
    %345 = arith.negf %344 : vector<4x128xf32>
    %346 = math.exp %345 : vector<4x128xf32>
    %cst_130 = arith.constant 1.000000e+00 : f32
    %347 = vector.broadcast %cst_130 : f32 to vector<4x128xf32>
    %348 = arith.addf %347, %346 : vector<4x128xf32>
    %349 = arith.divf %347, %348 : vector<4x128xf32>
    %350 = math.tanh %344 : vector<4x128xf32>
    %351 = vector.extract_strided_slice %349 {offsets = [0, 0], sizes = [4, 32], strides = [1, 1]} : vector<4x128xf32> to vector<4x32xf32>
    %352 = vector.extract_strided_slice %349 {offsets = [0, 32], sizes = [4, 32], strides = [1, 1]} : vector<4x128xf32> to vector<4x32xf32>
    %353 = vector.extract_strided_slice %350 {offsets = [0, 64], sizes = [4, 32], strides = [1, 1]} : vector<4x128xf32> to vector<4x32xf32>
    %354 = vector.extract_strided_slice %349 {offsets = [0, 96], sizes = [4, 32], strides = [1, 1]} : vector<4x128xf32> to vector<4x32xf32>
    %355 = arith.mulf %352, %337 : vector<4x32xf32>
    %356 = arith.mulf %351, %353 : vector<4x32xf32>
    %357 = arith.addf %355, %356 : vector<4x32xf32>
    %358 = math.tanh %357 : vector<4x32xf32>
    %359 = arith.mulf %354, %358 : vector<4x32xf32>
    %c12_131 = arith.constant 12 : index
    %c0_132 = arith.constant 0 : index
    %360 = vector.load %arg7[%c12_131, %c0_132] : memref<16x32xf32, #tpu.memory_space<vmem>>, vector<4x32xf32>
    tpu.vector_store %arg7[%c12_131, %c0_132], %359 {strides = array<i32>} : memref<16x32xf32, #tpu.memory_space<vmem>>, vector<4x32xf32>,
    %c0_133 = arith.constant 0 : index
    %c0_134 = arith.constant 0 : index
    %361 = vector.load %arg7[%c0_133, %c0_134] : memref<16x32xf32, #tpu.memory_space<vmem>>, vector<16x32xf32>
    %c2_135 = arith.constant 2 : index
    %c0_136 = arith.constant 0 : index
    %c0_137 = arith.constant 0 : index
    %362 = vector.load %arg2[%c2_135, %c0_136, %c0_137] : memref<3x32x128xbf16, #tpu.memory_space<vmem>>, vector<1x32x128xbf16>
    %363 = vector.shape_cast %362 : vector<1x32x128xbf16> to vector<32x128xbf16>
    %c3 = arith.constant 3 : index
    %c0_138 = arith.constant 0 : index
    %c0_139 = arith.constant 0 : index
    %364 = vector.load %arg3[%c3, %c0_138, %c0_139] : memref<4x32x128xbf16, #tpu.memory_space<vmem>>, vector<1x32x128xbf16>
    %365 = vector.shape_cast %364 : vector<1x32x128xbf16> to vector<32x128xbf16>
    %c3_140 = arith.constant 3 : index
    %c0_141 = arith.constant 0 : index
    %c0_142 = arith.constant 0 : index
    %366 = vector.load %arg4[%c3_140, %c0_141, %c0_142] : memref<4x1x128xf32, #tpu.memory_space<vmem>>, vector<1x1x128xf32>
    %367 = vector.shape_cast %366 : vector<1x1x128xf32> to vector<1x128xf32>
    %368 = arith.truncf %361 : vector<16x32xf32> to vector<16x32xbf16>
    %cst_143 = arith.constant dense<0.000000e+00> : vector<16x128xf32>
    %369 = tpu.matmul %368, %363, %cst_143 {dimension_numbers = #tpu.dot_dimension_numbers<[1], [0], [0], [1], [0, 0, 1, 1], [], []>} : vector<16x32xbf16>, vector<32x128xbf16>, vector<16x128xf32> -> vector<16x128xf32>
    %370 = vector.broadcast %367 : vector<1x128xf32> to vector<16x128xf32>
    %371 = arith.addf %369, %370 : vector<16x128xf32>
    %c0_144 = arith.constant 0 : index
    %c0_145 = arith.constant 0 : index
    %372 = vector.load %arg6[%c0_144, %c0_145] : memref<16x128xf32, #tpu.memory_space<vmem>>, vector<16x128xf32>
    tpu.vector_store %arg6[%c0_144, %c0_145], %371 {strides = array<i32>} : memref<16x128xf32, #tpu.memory_space<vmem>>, vector<16x128xf32>,
    %cst_146 = arith.constant 0.000000e+00 : f32
    %373 = vector.broadcast %cst_146 : f32 to vector<8x32xf32>
    %cst_147 = arith.constant 0.000000e+00 : f32
    %374 = vector.broadcast %cst_147 : f32 to vector<8x32xf32>
    %c0_148 = arith.constant 0 : index
    %c0_149 = arith.constant 0 : index
    %375 = vector.load %arg6[%c0_148, %c0_149] : memref<16x128xf32, #tpu.memory_space<vmem>>, vector<8x128xf32>
    %376 = arith.truncf %373 : vector<8x32xf32> to vector<8x32xbf16>
    %cst_150 = arith.constant dense<0.000000e+00> : vector<8x128xf32>
    %377 = tpu.matmul %376, %365, %cst_150 {dimension_numbers = #tpu.dot_dimension_numbers<[1], [0], [0], [1], [0, 0, 1, 1], [], []>} : vector<8x32xbf16>, vector<32x128xbf16>, vector<8x128xf32> -> vector<8x128xf32>
    %378 = arith.addf %375, %377 : vector<8x128xf32>
    %379 = arith.negf %378 : vector<8x128xf32>
    %380 = math.exp %379 : vector<8x128xf32>
    %cst_151 = arith.constant 1.000000e+00 : f32
    %381 = vector.broadcast %cst_151 : f32 to vector<8x128xf32>
    %382 = arith.addf %381, %380 : vector<8x128xf32>
    %383 = arith.divf %381, %382 : vector<8x128xf32>
    %384 = math.tanh %378 : vector<8x128xf32>
    %385 = vector.extract_strided_slice %383 {offsets = [0, 0], sizes = [8, 32], strides = [1, 1]} : vector<8x128xf32> to vector<8x32xf32>
    %386 = vector.extract_strided_slice %383 {offsets = [0, 32], sizes = [8, 32], strides = [1, 1]} : vector<8x128xf32> to vector<8x32xf32>
    %387 = vector.extract_strided_slice %384 {offsets = [0, 64], sizes = [8, 32], strides = [1, 1]} : vector<8x128xf32> to vector<8x32xf32>
    %388 = vector.extract_strided_slice %383 {offsets = [0, 96], sizes = [8, 32], strides = [1, 1]} : vector<8x128xf32> to vector<8x32xf32>
    %389 = arith.mulf %386, %374 : vector<8x32xf32>
    %390 = arith.mulf %385, %387 : vector<8x32xf32>
    %391 = arith.addf %389, %390 : vector<8x32xf32>
    %392 = math.tanh %391 : vector<8x32xf32>
    %393 = arith.mulf %388, %392 : vector<8x32xf32>
    %c0_152 = arith.constant 0 : index
    %c0_153 = arith.constant 0 : index
    %394 = vector.load %arg7[%c0_152, %c0_153] : memref<16x32xf32, #tpu.memory_space<vmem>>, vector<8x32xf32>
    tpu.vector_store %arg7[%c0_152, %c0_153], %393 {strides = array<i32>} : memref<16x32xf32, #tpu.memory_space<vmem>>, vector<8x32xf32>,
    %c8_154 = arith.constant 8 : index
    %c0_155 = arith.constant 0 : index
    %395 = vector.load %arg6[%c8_154, %c0_155] : memref<16x128xf32, #tpu.memory_space<vmem>>, vector<8x128xf32>
    %396 = arith.truncf %393 : vector<8x32xf32> to vector<8x32xbf16>
    %cst_156 = arith.constant dense<0.000000e+00> : vector<8x128xf32>
    %397 = tpu.matmul %396, %365, %cst_156 {dimension_numbers = #tpu.dot_dimension_numbers<[1], [0], [0], [1], [0, 0, 1, 1], [], []>} : vector<8x32xbf16>, vector<32x128xbf16>, vector<8x128xf32> -> vector<8x128xf32>
    %398 = arith.addf %395, %397 : vector<8x128xf32>
    %399 = arith.negf %398 : vector<8x128xf32>
    %400 = math.exp %399 : vector<8x128xf32>
    %cst_157 = arith.constant 1.000000e+00 : f32
    %401 = vector.broadcast %cst_157 : f32 to vector<8x128xf32>
    %402 = arith.addf %401, %400 : vector<8x128xf32>
    %403 = arith.divf %401, %402 : vector<8x128xf32>
    %404 = math.tanh %398 : vector<8x128xf32>
    %405 = vector.extract_strided_slice %403 {offsets = [0, 0], sizes = [8, 32], strides = [1, 1]} : vector<8x128xf32> to vector<8x32xf32>
    %406 = vector.extract_strided_slice %403 {offsets = [0, 32], sizes = [8, 32], strides = [1, 1]} : vector<8x128xf32> to vector<8x32xf32>
    %407 = vector.extract_strided_slice %404 {offsets = [0, 64], sizes = [8, 32], strides = [1, 1]} : vector<8x128xf32> to vector<8x32xf32>
    %408 = vector.extract_strided_slice %403 {offsets = [0, 96], sizes = [8, 32], strides = [1, 1]} : vector<8x128xf32> to vector<8x32xf32>
    %409 = arith.mulf %406, %391 : vector<8x32xf32>
    %410 = arith.mulf %405, %407 : vector<8x32xf32>
    %411 = arith.addf %409, %410 : vector<8x32xf32>
    %412 = math.tanh %411 : vector<8x32xf32>
    %413 = arith.mulf %408, %412 : vector<8x32xf32>
    %c8_158 = arith.constant 8 : index
    %c0_159 = arith.constant 0 : index
    %414 = vector.load %arg7[%c8_158, %c0_159] : memref<16x32xf32, #tpu.memory_space<vmem>>, vector<8x32xf32>
    tpu.vector_store %arg7[%c8_158, %c0_159], %413 {strides = array<i32>} : memref<16x32xf32, #tpu.memory_space<vmem>>, vector<8x32xf32>,
    %c0_160 = arith.constant 0 : index
    %c0_161 = arith.constant 0 : index
    %415 = vector.load %arg7[%c0_160, %c0_161] : memref<16x32xf32, #tpu.memory_space<vmem>>, vector<16x32xf32>
    %416 = arith.addf %415, %267 : vector<16x32xf32>
    %c0_162 = arith.constant 0 : index
    %c0_163 = arith.constant 0 : index
    %417 = vector.load %arg5[%c0_162, %c0_163] : memref<16x32xf32, #tpu.memory_space<vmem>>, vector<16x32xf32>
    tpu.vector_store %arg5[%c0_162, %c0_163], %416 {strides = array<i32>} : memref<16x32xf32, #tpu.memory_space<vmem>>, vector<16x32xf32>,
    return
  }
}

</mosaic_0001>

<bundles_post_ra>
// kernel: tpu_custom_call.1
= control target key start
LH: loop header
LB: loop body
LE: loop exit
PB: predicated region body
PF: predicated region fallthrough
CT: control target
= control target key end

     0   :  { %10 = vsyncpa [#allocation5], 0  ;;  %s2818_s0 = inlined_call_operand.hbm [shape: f32[16,10], index: 0, kind: input, shape index: {}]   ;;  %s2819_s1 = inlined_call_operand.hbm [shape: bf16[10,128], index: 1, kind: input, shape index: {}]   ;;  %s2820_s2 = inlined_call_operand.hbm [shape: bf16[3,32,128], index: 2, kind: input, shape index: {}]   ;;  %s2821_s3 = inlined_call_operand.hbm [shape: bf16[4,32,128], index: 3, kind: input, shape index: {}]   ;;  %s2822_s4 = inlined_call_operand.vmem [shape: f32[4,1,128], index: 4, kind: input, shape index: {}]   ;;  %s2823_s5 = inlined_call_operand.hbm [shape: f32[16,32], index: 5, kind: output, shape index: {}]  }
   0x1   :  { %11 = vsyncpa [#allocation8], 0 }
   0x2   :  { %12 = vsyncpa [#allocation11], 0 }
   0x3   :  { %13 = vsyncpa [#allocation6], 0  ;;  %s2417_s18 = smov [#allocation7]  }
   0x4   :  { %s31_s19 = sshll.u32 %s2417_s18, 4  ;;  %s32_s19 = int_to_ptr.vmem [resolvable:$true] %s31_s19 }
   0x5   :  { %s2317_s20 = scalar_lea.vmem %s32_s19, 128  ;;  %p2322_p1 = scmp.lt.s32.totalorder %s32_s19, %s32_s19 }
   0x6   :  { %p2318_p0 = scmp.ne.s32.totalorder %s32_s19, %s2317_s20  ;;  %p2323_p2 = scmp.lt.s32.totalorder %s2317_s20, %s2317_s20 }
   0x8   :  { %p2324_p3 = por %p2323_p2, %p2322_p1 }
   0xa   :  { %p2325_p4 = pnand %p2324_p3, %p2318_p0 }
   0xc   :  { %2328 = shalt.err (!%p2325_p4)
}
   0xd   :  { %s2418_s21 = smov 64   ;;  %s2419_s22 = smov 4  }
   0xe   :  { %37 = dma.hbm_to_vmem [thread:$0]  %s2819_s1, 128, %s32_s19, [#allocation8], %s2418_s21, %s2418_s21, %s2419_s22  }
   0xf   :  { %s2420_s25 = smov [#allocation4]  }
  0x10   :  { %s19_s26 = sshll.u32 %s2420_s25, 4  ;;  %s20_s26 = int_to_ptr.vmem [resolvable:$true] %s19_s26 }
  0x11   :  { %s2337_s27 = scalar_lea.vmem %s20_s26, 256  ;;  %p2342_p6 = scmp.lt.s32.totalorder %s20_s26, %s20_s26 }
  0x12   :  { %p2338_p5 = scmp.ne.s32.totalorder %s20_s26, %s2337_s27  ;;  %p2343_p7 = scmp.lt.s32.totalorder %s2337_s27, %s2337_s27 }
  0x14   :  { %p2344_p8 = por %p2343_p7, %p2342_p6 }
  0x16   :  { %p2345_p9 = pnand %p2344_p8, %p2338_p5 }
  0x18   :  { %2348 = shalt.err (!%p2345_p9)
}
  0x19   :  { %s2421_s28 = smov 128   ;;  %s2422_s29 = smov 8  }
  0x1a   :  { %25 = dma.hbm_to_vmem [thread:$0]  %s2818_s0, 256, %s20_s26, [#allocation5], %s2421_s28, %s2421_s28, %s2422_s29  }
  0x1b   :  { %s2423_s1 = smov [#allocation9]   ;;  %s2424_s8 = smov [#allocation10]  }
  0x1c   :  { %s43_s7 = sshll.u32 %s2423_s1, 4  ;;  %s55_s9 = sshll.u32 %s2424_s8, 4  ;;  %s44_s7 = int_to_ptr.vmem [resolvable:$true] %s43_s7  ;;  %s56_s9 = int_to_ptr.vmem [resolvable:$true] %s55_s9 }
  0x1d   :  { %s2357_s10 = scalar_lea.vmem %s44_s7, 768  ;;  %p2362_p11 = scmp.lt.s32.totalorder %s44_s7, %s44_s7 }
  0x1e   :  { %p2358_p10 = scmp.ne.s32.totalorder %s44_s7, %s2357_s10  ;;  %p2363_p12 = scmp.lt.s32.totalorder %s2357_s10, %s2357_s10 }
  0x20   :  { %p2364_p13 = por %p2363_p12, %p2362_p11 }
  0x22   :  { %p2365_p0 = pnand %p2364_p13, %p2358_p10 }
  0x24   :  { %2368 = shalt.err (!%p2365_p0)
}
  0x25   :  { %49 = dma.hbm_to_vmem [thread:$0]  %s2820_s2, 768, %s44_s7, [#allocation8], %s2418_s21, %s2418_s21, %s2419_s22  }
  0x26   :  { %s2377_s0 = scalar_lea.vmem %s56_s9, 1024  ;;  %p2382_p2 = scmp.lt.s32.totalorder %s56_s9, %s56_s9 }
  0x27   :  { %p2378_p1 = scmp.ne.s32.totalorder %s56_s9, %s2377_s0  ;;  %p2383_p3 = scmp.lt.s32.totalorder %s2377_s0, %s2377_s0 }
  0x29   :  { %p2384_p4 = por %p2383_p3, %p2382_p2 }
  0x2b   :  { %p2385_p5 = pnand %p2384_p4, %p2378_p1 }
  0x2d   :  { %2388 = shalt.err (!%p2385_p5)
}
  0x2e   :  { %61 = dma.hbm_to_vmem [thread:$0]  %s2821_s3, 1024, %s56_s9, [#allocation11], %s2418_s21, %s2418_s21, %s2419_s22  }
  0x2f   :  { %2409 = dma.done.wait [#allocation5], 256  }
  0x30   :  { %2410 = vsyncadd [#allocation5], 4294967040 }
  0x31   :  { %2411 = dma.done.wait [#allocation8], 896  }
  0x32   :  { %2412 = vsyncadd [#allocation8], 4294966400 }
  0x33   :  { %2413 = dma.done.wait [#allocation11], 1024  }
  0x34   :  { %2414 = vsyncadd [#allocation11], 4294966272  ;;  %v2425_v0 = vmov 0.0   ;;  %vm2426_vm0 = vmmov 0   ;;  %vm102_vm1 = vcmask 1044480   ;;  %v2490_v2 = vld [vmem:[#allocation10 + $0x8] sm:$0xff]  }
  0x35   :  { %1963 = vmatprep.subr.bf16.mxu0 %v2425_v0  ;;  %1969 = vmatprep.subr.bf16.mxu1 %v2425_v0  ;;  %v2150_v1 = vld [vmem:[#allocation7] sm:$0x1f]   ;;  %v77_v4 = vld [vmem:[#allocation4] sm:$0xff]  ;;  %v78_v5 = vld [vmem:[#allocation4 + $0x8] sm:$0xff]  ;;  %vm98_vm2 = vcmask 80896   ;;  %v2427_v8 = vmov 0  }
  0x36   :  { %1965 = vmatprep.mubr.msk.bf16.mxu0 %vm2426_vm0, %v2425_v0  ;;  %1973 = vmatprep.mubr.msk.bf16.mxu1 %vm2426_vm0, %v2425_v0  ;;  %v104_v3 = vsel %vm102_vm1, %v2150_v1, 0  ;;  %v86_v6 = vpack.c.bf16 %v78_v5, %v77_v4  ;;  %v2493_v7 = vld [vmem:[#allocation10] sm:$0xff]   ;;  %v1840_v9 = vld [vmem:[%s2822_s4] ss:$0 sm:$0xff]  ;;  %s2428_s15 = smov 32   ;;  %vm162_vm3 = vcmask 261120  }
  0x37   :  { %1964 = vmatpush3.bf16.msra.mxu0 %v104_v3  ;;  %1970 = vmatpush3.bf16.msra.mxu1 %v2490_v2  ;;  %vm235_vm4 = vcmask 254976   ;;  %vm943_vm5 = vcmask 257024  }
  0x38   :  { %1971 = vmatprep.subr.bf16.mxu1 %v2425_v0  ;;  %1977 = vmatprep.subr.bf16.mxu0 %v2425_v0 }
  0x3a   :  { %1966 = vmatmul.mubr.msk.bf16.vlgmr.msra.gmra.mxu0 %vm98_vm2, %v86_v6 }
  0x3b   :  { %1972 = vmatpush3.bf16.msra.mxu1 %v2493_v7  ;;  %1978 = vmatpush3.bf16.msra.mxu0 %v2490_v2 }
  0x3c   :  { %1979 = vmatprep.subr.bf16.mxu0 %v2425_v0  ;;  %1981 = vmatprep.mubr.msk.bf16.mxu0 %vm2426_vm0, %v2425_v0 }
  0x3d   :  { %1985 = vmatprep.subr.bf16.mxu1 %v2425_v0 }
  0x3e   :  { %1974 = vmatmul.mubr.bf16.vlgmr.msra.gmra.mxu1 %v2427_v8 }
  0x3f   :  { %1980 = vmatpush3.bf16.msra.mxu0 %v2493_v7  ;;  %1986 = vmatpush3.bf16.msra.mxu1 %v2490_v2 }
  0x40   :  { %1987 = vmatprep.subr.bf16.mxu1 %v2425_v0  ;;  %1989 = vmatprep.mubr.msk.bf16.mxu1 %vm2426_vm0, %v2425_v0 }
  0x41   :  { %1993 = vmatprep.subr.bf16.mxu0 %v2425_v0 }
  0x43   :  { %1988 = vmatpush3.bf16.msra.mxu1 %v2493_v7 }
  0x44   :  { %2001 = vmatprep.subr.bf16.mxu1 %v2425_v0 }
  0xfa   :  { %v140_v10 = vpop.f32.mrf.mxu0 }
  0xfb   :  { %v141_v11 = vadd.f32 %v1840_v9, %v140_v10 }
  0xfc   :  { %v1967_v12 = vpop.f32.mrf.mxu0 }
  0xfd   :  { %147 = vst [vmem:[#allocation2] sm:$0xff] %v141_v11 }
  0xfe   :  { %v143_v13 = vpop.f32.mrf.mxu0  ;;  %v200_v14 = vpop.f32.mrf.mxu1 }
  0xff   :  { %v144_v15 = vadd.f32 %v1840_v9, %v143_v13 }
 0x100   :  { %v1968_v16 = vpop.f32.mrf.mxu0  ;;  %v1975_v17 = vpop.f32.mrf.mxu1 }
 0x101   :  { %148 = vst [vmem:[#allocation2 + $0x8] sm:$0xff] %v144_v15 }
 0x102   :  { %v203_v18 = vpop.f32.mrf.mxu1 }
 0x104   :  { %v149_v19 = vld [vmem:[#allocation2] sm:$0x3]  ;;  %v1976_v20 = vpop.f32.mrf.mxu1  ;;  %v237_v37 = vld [vmem:[#allocation2 + $0x2] sm:$0x3]  ;;  %v315_v58 = vld [vmem:[#allocation2 + $0x4] sm:$0x3] }
 0x105   :  { %v206_v21 = vadd.f32 %v200_v14, %v149_v19  ;;  %v393_v19 = vld [vmem:[#allocation2 + $0x6] sm:$0x3] }
 0x107   :  { %2165 = vtanh.f32 %v206_v21  ;;  %v1845_v23 = vmul.f32 -1.442695, %v206_v21 }
 0x109   :  { %2167 = vpow2.f32 %v1845_v23 }
 0x114   :  { %v2166_v22 = vpop.eup %2165 }
 0x115   :  { %216 = vrot.lane.b32.xlu0 %v2166_v22, %s2418_s21 }
 0x116   :  { %v2168_v24 = vpop.eup %2167 }
 0x117   :  { %v210_v25 = vadd.f32 1.0, %v2168_v24 }
 0x119   :  { %2169 = vrcp.f32 %v210_v25 }
 0x126   :  { %v2170_v26 = vpop.eup %2169 }
 0x127   :  { %v214_v29 = vmul.f32 0.0, %v2170_v26 }
 0x187   :  { %v217_v27 = vpop.permute.xlu0 %216 }
 0x188   :  { %v219_v28 = vmul.f32 %v2170_v26, %v217_v27 }
 0x18a   :  { %221 = vrot.lane.b32.xlu0 %v219_v28, %s2428_s15 }
 0x1fc   :  { %v222_v30 = vpop.permute.xlu0 %221 }
 0x1fd   :  { %v224_v31 = vadd.f32 %v222_v30, %v214_v29 }
 0x1ff   :  { %2171 = vtanh.f32 %v224_v31 }
 0x20c   :  { %v2172_v32 = vpop.eup %2171 }
 0x20d   :  { %227 = vrot.lane.b32.xlu1 %v2172_v32, %s2418_s21 }
 0x27f   :  { %v228_v33 = vpop.permute.xlu1 %227 }
 0x280   :  { %v2518_v34 = vmul.f32 %v2170_v26, %v228_v33 }
 0x282   :  { %v238_v35 = vpack.c.bf16 %v2518_v34, %v2518_v34 }
 0x284   :  { %240 = vrot.lane.b32.xlu1 %v238_v35, %s2428_s15 }
 0x2f6   :  { %v241_v36 = vpop.permute.xlu1 %240 }
 0x2f7   :  { %1982 = vmatmul.mubr.msk.bf16.vlgmr.msra.gmra.mxu0 %vm162_vm3, %v241_v36 }
 0x2f8   :  { %1994 = vmatpush3.bf16.msra.mxu0 %v2490_v2  ;;  %1997 = vmatprep.mubr.msk.bf16.mxu0 %vm2426_vm0, %v2425_v0 }
 0x2f9   :  { %1995 = vmatprep.subr.bf16.mxu0 %v2425_v0 }
 0x2fc   :  { %1996 = vmatpush3.bf16.msra.mxu0 %v2493_v7 }
 0x2fd   :  { %2009 = vmatprep.subr.bf16.mxu0 %v2425_v0 }
 0x3b7   :  { %v279_v38 = vpop.f32.mrf.mxu0 }
 0x3b8   :  { %v285_v39 = vadd.f32 %v279_v38, %v237_v37 }
 0x3b9   :  { %v1983_v40 = vpop.f32.mrf.mxu0 }
 0x3ba   :  { %2173 = vtanh.f32 %v285_v39  ;;  %v1847_v44 = vmul.f32 -1.442695, %v285_v39 }
 0x3bb   :  { %v282_v41 = vpop.f32.mrf.mxu0 }
 0x3bc   :  { %2175 = vpow2.f32 %v1847_v44  ;;  %v471_v41 = vld [vmem:[#allocation2 + $0x8] sm:$0x3] }
 0x3bd   :  { %v1984_v42 = vpop.f32.mrf.mxu0 }
 0x3c7   :  { %v2174_v43 = vpop.eup %2173 }
 0x3c8   :  { %295 = vrot.lane.b32.xlu0 %v2174_v43, %s2418_s21 }
 0x3c9   :  { %v2176_v45 = vpop.eup %2175 }
 0x3ca   :  { %v289_v46 = vadd.f32 1.0, %v2176_v45 }
 0x3cc   :  { %2177 = vrcp.f32 %v289_v46 }
 0x3d9   :  { %v2178_v47 = vpop.eup %2177 }
 0x3da   :  { %v293_v50 = vmul.f32 %v2178_v47, %v224_v31 }
 0x43a   :  { %v296_v48 = vpop.permute.xlu0 %295 }
 0x43b   :  { %v298_v49 = vmul.f32 %v2178_v47, %v296_v48 }
 0x43d   :  { %300 = vrot.lane.b32.xlu1 %v298_v49, %s2428_s15 }
 0x4af   :  { %v301_v51 = vpop.permute.xlu1 %300 }
 0x4b0   :  { %v303_v52 = vadd.f32 %v301_v51, %v293_v50 }
 0x4b2   :  { %2179 = vtanh.f32 %v303_v52 }
 0x4bf   :  { %v2180_v53 = vpop.eup %2179 }
 0x4c0   :  { %306 = vrot.lane.b32.xlu0 %v2180_v53, %s2418_s21 }
 0x532   :  { %v307_v54 = vpop.permute.xlu0 %306 }
 0x533   :  { %v2533_v55 = vmul.f32 %v2178_v47, %v307_v54 }
 0x535   :  { %v316_v56 = vpack.c.bf16 %v2533_v55, %v2533_v55 }
 0x537   :  { %318 = vrot.lane.b32.xlu1 %v316_v56, %s2428_s15 }
 0x5a9   :  { %v319_v57 = vpop.permute.xlu1 %318 }
 0x5aa   :  { %1990 = vmatmul.mubr.msk.bf16.vlgmr.msra.gmra.mxu1 %vm162_vm3, %v319_v57 }
 0x5ab   :  { %2002 = vmatpush3.bf16.msra.mxu1 %v2490_v2  ;;  %2005 = vmatprep.mubr.msk.bf16.mxu1 %vm2426_vm0, %v2425_v0 }
 0x5ac   :  { %2003 = vmatprep.subr.bf16.mxu1 %v2425_v0 }
 0x5af   :  { %2004 = vmatpush3.bf16.msra.mxu1 %v2493_v7 }
 0x5b0   :  { %2017 = vmatprep.subr.bf16.mxu1 %v2425_v0 }
 0x66a   :  { %v357_v59 = vpop.f32.mrf.mxu1 }
 0x66b   :  { %v363_v60 = vadd.f32 %v357_v59, %v315_v58 }
 0x66c   :  { %v1991_v61 = vpop.f32.mrf.mxu1 }
 0x66d   :  { %2181 = vtanh.f32 %v363_v60  ;;  %v1849_v3 = vmul.f32 -1.442695, %v363_v60 }
 0x66e   :  { %v360_v62 = vpop.f32.mrf.mxu1 }
 0x66f   :  { %2183 = vpow2.f32 %v1849_v3 }
 0x670   :  { %v1992_v63 = vpop.f32.mrf.mxu1 }
 0x671   :  { %v549_v63 = vld [vmem:[#allocation2 + $0xa] sm:$0x3] }
 0x67a   :  { %v2182_v1 = vpop.eup %2181 }
 0x67b   :  { %373 = vrot.lane.b32.xlu0 %v2182_v1, %s2418_s21 }
 0x67c   :  { %v2184_v4 = vpop.eup %2183 }
 0x67d   :  { %v367_v5 = vadd.f32 1.0, %v2184_v4 }
 0x67f   :  { %2185 = vrcp.f32 %v367_v5 }
 0x68c   :  { %v2186_v6 = vpop.eup %2185 }
 0x68d   :  { %v371_v11 = vmul.f32 %v2186_v6, %v303_v52 }
 0x6ed   :  { %v374_v9 = vpop.permute.xlu0 %373 }
 0x6ee   :  { %v376_v10 = vmul.f32 %v2186_v6, %v374_v9 }
 0x6f0   :  { %378 = vrot.lane.b32.xlu1 %v376_v10, %s2428_s15 }
 0x762   :  { %v379_v12 = vpop.permute.xlu1 %378 }
 0x763   :  { %v381_v13 = vadd.f32 %v379_v12, %v371_v11 }
 0x765   :  { %2187 = vtanh.f32 %v381_v13 }
 0x772   :  { %v2188_v14 = vpop.eup %2187 }
 0x773   :  { %384 = vrot.lane.b32.xlu0 %v2188_v14, %s2418_s21 }
 0x7e5   :  { %v385_v15 = vpop.permute.xlu0 %384 }
 0x7e6   :  { %v2548_v16 = vmul.f32 %v2186_v6, %v385_v15 }
 0x7e8   :  { %v394_v17 = vpack.c.bf16 %v2548_v16, %v2548_v16 }
 0x7ea   :  { %396 = vrot.lane.b32.xlu1 %v394_v17, %s2428_s15 }
 0x85c   :  { %v397_v18 = vpop.permute.xlu1 %396 }
 0x85d   :  { %1998 = vmatmul.mubr.msk.bf16.vlgmr.msra.gmra.mxu0 %vm162_vm3, %v397_v18 }
 0x85e   :  { %2010 = vmatpush3.bf16.msra.mxu0 %v2490_v2  ;;  %2013 = vmatprep.mubr.msk.bf16.mxu0 %vm2426_vm0, %v2425_v0 }
 0x85f   :  { %2011 = vmatprep.subr.bf16.mxu0 %v2425_v0 }
 0x862   :  { %2012 = vmatpush3.bf16.msra.mxu0 %v2493_v7 }
 0x863   :  { %2025 = vmatprep.subr.bf16.mxu0 %v2425_v0 }
 0x91d   :  { %v435_v20 = vpop.f32.mrf.mxu0 }
 0x91e   :  { %v441_v21 = vadd.f32 %v435_v20, %v393_v19 }
 0x91f   :  { %v1999_v22 = vpop.f32.mrf.mxu0 }
 0x920   :  { %2189 = vtanh.f32 %v441_v21  ;;  %v1851_v26 = vmul.f32 -1.442695, %v441_v21 }
 0x921   :  { %v438_v23 = vpop.f32.mrf.mxu0 }
 0x922   :  { %2191 = vpow2.f32 %v1851_v26  ;;  %v627_v23 = vld [vmem:[#allocation2 + $0xc] sm:$0x3] }
 0x923   :  { %v2000_v24 = vpop.f32.mrf.mxu0 }
 0x92d   :  { %v2190_v25 = vpop.eup %2189 }
 0x92e   :  { %451 = vrot.lane.b32.xlu0 %v2190_v25, %s2418_s21 }
 0x92f   :  { %v2192_v27 = vpop.eup %2191 }
 0x930   :  { %v445_v28 = vadd.f32 1.0, %v2192_v27 }
 0x932   :  { %2193 = vrcp.f32 %v445_v28 }
 0x93f   :  { %v2194_v29 = vpop.eup %2193 }
 0x940   :  { %v449_v32 = vmul.f32 %v2194_v29, %v381_v13 }
 0x9a0   :  { %v452_v30 = vpop.permute.xlu0 %451 }
 0x9a1   :  { %v454_v31 = vmul.f32 %v2194_v29, %v452_v30 }
 0x9a3   :  { %456 = vrot.lane.b32.xlu1 %v454_v31, %s2428_s15 }
 0xa15   :  { %v457_v33 = vpop.permute.xlu1 %456 }
 0xa16   :  { %v459_v35 = vadd.f32 %v457_v33, %v449_v32 }
 0xa18   :  { %2195 = vtanh.f32 %v459_v35 }
 0xa25   :  { %v2196_v36 = vpop.eup %2195 }
 0xa26   :  { %462 = vrot.lane.b32.xlu0 %v2196_v36, %s2418_s21 }
 0xa98   :  { %v463_v37 = vpop.permute.xlu0 %462 }
 0xa99   :  { %v2563_v38 = vmul.f32 %v2194_v29, %v463_v37 }
 0xa9b   :  { %v472_v39 = vpack.c.bf16 %v2563_v38, %v2563_v38 }
 0xa9d   :  { %474 = vrot.lane.b32.xlu1 %v472_v39, %s2428_s15 }
 0xb0f   :  { %v475_v40 = vpop.permute.xlu1 %474 }
 0xb10   :  { %2006 = vmatmul.mubr.msk.bf16.vlgmr.msra.gmra.mxu1 %vm162_vm3, %v475_v40 }
 0xb11   :  { %2018 = vmatpush3.bf16.msra.mxu1 %v2490_v2  ;;  %2021 = vmatprep.mubr.msk.bf16.mxu1 %vm2426_vm0, %v2425_v0 }
 0xb12   :  { %2019 = vmatprep.subr.bf16.mxu1 %v2425_v0 }
 0xb15   :  { %2020 = vmatpush3.bf16.msra.mxu1 %v2493_v7 }
 0xb16   :  { %2033 = vmatprep.subr.bf16.mxu1 %v2425_v0 }
 0xbd0   :  { %v513_v42 = vpop.f32.mrf.mxu1 }
 0xbd1   :  { %v519_v43 = vadd.f32 %v513_v42, %v471_v41 }
 0xbd2   :  { %v2007_v44 = vpop.f32.mrf.mxu1 }
 0xbd3   :  { %2197 = vtanh.f32 %v519_v43  ;;  %v1853_v48 = vmul.f32 -1.442695, %v519_v43 }
 0xbd4   :  { %v516_v45 = vpop.f32.mrf.mxu1 }
 0xbd5   :  { %2199 = vpow2.f32 %v1853_v48 }
 0xbd6   :  { %v2008_v46 = vpop.f32.mrf.mxu1 }
 0xbd7   :  { %v705_v46 = vld [vmem:[#allocation2 + $0xe] sm:$0x3] }
 0xbe0   :  { %v2198_v47 = vpop.eup %2197 }
 0xbe1   :  { %529 = vrot.lane.b32.xlu0 %v2198_v47, %s2418_s21 }
 0xbe2   :  { %v2200_v49 = vpop.eup %2199 }
 0xbe3   :  { %v523_v50 = vadd.f32 1.0, %v2200_v49 }
 0xbe5   :  { %2201 = vrcp.f32 %v523_v50 }
 0xbf2   :  { %v2202_v51 = vpop.eup %2201 }
 0xbf3   :  { %v527_v54 = vmul.f32 %v2202_v51, %v459_v35 }
 0xc53   :  { %v530_v52 = vpop.permute.xlu0 %529 }
 0xc54   :  { %v532_v53 = vmul.f32 %v2202_v51, %v530_v52 }
 0xc56   :  { %534 = vrot.lane.b32.xlu1 %v532_v53, %s2428_s15 }
 0xcc8   :  { %v535_v56 = vpop.permute.xlu1 %534 }
 0xcc9   :  { %v537_v57 = vadd.f32 %v535_v56, %v527_v54 }
 0xccb   :  { %2203 = vtanh.f32 %v537_v57 }
 0xcd8   :  { %v2204_v58 = vpop.eup %2203 }
 0xcd9   :  { %540 = vrot.lane.b32.xlu0 %v2204_v58, %s2418_s21 }
 0xd4b   :  { %v541_v59 = vpop.permute.xlu0 %540 }
 0xd4c   :  { %v2578_v60 = vmul.f32 %v2202_v51, %v541_v59 }
 0xd4e   :  { %v550_v61 = vpack.c.bf16 %v2578_v60, %v2578_v60 }
 0xd50   :  { %552 = vrot.lane.b32.xlu1 %v550_v61, %s2428_s15 }
 0xdc2   :  { %v553_v62 = vpop.permute.xlu1 %552 }
 0xdc3   :  { %2014 = vmatmul.mubr.msk.bf16.vlgmr.msra.gmra.mxu0 %vm162_vm3, %v553_v62 }
 0xdc4   :  { %2026 = vmatpush3.bf16.msra.mxu0 %v2490_v2  ;;  %2029 = vmatprep.mubr.msk.bf16.mxu0 %vm2426_vm0, %v2425_v0 }
 0xdc5   :  { %2027 = vmatprep.subr.bf16.mxu0 %v2425_v0 }
 0xdc8   :  { %2028 = vmatpush3.bf16.msra.mxu0 %v2493_v7 }
 0xdc9   :  { %2041 = vmatprep.subr.bf16.mxu0 %v2425_v0 }
 0xe83   :  { %v591_v1 = vpop.f32.mrf.mxu0 }
 0xe84   :  { %v597_v3 = vadd.f32 %v591_v1, %v549_v63 }
 0xe85   :  { %v2015_v4 = vpop.f32.mrf.mxu0 }
 0xe86   :  { %2205 = vtanh.f32 %v597_v3  ;;  %v1855_v2 = vmul.f32 -1.442695, %v597_v3 }
 0xe87   :  { %v594_v5 = vpop.f32.mrf.mxu0 }
 0xe88   :  { %2207 = vpow2.f32 %v1855_v2  ;;  %v2628_v5 = vld [vmem:[#allocation10 + $0x18] sm:$0xff]  }
 0xe89   :  { %v2016_v6 = vpop.f32.mrf.mxu0 }
 0xe8a   :  { %v2154_v6 = vld [vmem:[#allocation9] sm:$0xff]  }
 0xe93   :  { %v2206_v9 = vpop.eup %2205 }
 0xe94   :  { %607 = vrot.lane.b32.xlu0 %v2206_v9, %s2418_s21  ;;  %v2634_v9 = vld [vmem:[#allocation10 + $0x10] sm:$0xff]  }
 0xe95   :  { %v2208_v10 = vpop.eup %2207 }
 0xe96   :  { %v601_v11 = vadd.f32 1.0, %v2208_v10 }
 0xe98   :  { %2209 = vrcp.f32 %v601_v11 }
 0xea5   :  { %v2210_v12 = vpop.eup %2209 }
 0xea6   :  { %v605_v14 = vmul.f32 %v2210_v12, %v537_v57 }
 0xf06   :  { %v608_v13 = vpop.permute.xlu0 %607 }
 0xf07   :  { %v610_v7 = vmul.f32 %v2210_v12, %v608_v13 }
 0xf09   :  { %612 = vrot.lane.b32.xlu1 %v610_v7, %s2428_s15 }
 0xf7b   :  { %v613_v15 = vpop.permute.xlu1 %612 }
 0xf7c   :  { %v615_v17 = vadd.f32 %v613_v15, %v605_v14 }
 0xf7e   :  { %2211 = vtanh.f32 %v615_v17 }
 0xf8b   :  { %v2212_v18 = vpop.eup %2211 }
 0xf8c   :  { %618 = vrot.lane.b32.xlu0 %v2212_v18, %s2418_s21 }
 0xffe   :  { %v619_v19 = vpop.permute.xlu0 %618 }
 0xfff   :  { %v2593_v20 = vmul.f32 %v2210_v12, %v619_v19 }
0x1001   :  { %v628_v21 = vpack.c.bf16 %v2593_v20, %v2593_v20 }
0x1003   :  { %630 = vrot.lane.b32.xlu1 %v628_v21, %s2428_s15 }
0x1075   :  { %v631_v22 = vpop.permute.xlu1 %630 }
0x1076   :  { %2022 = vmatmul.mubr.msk.bf16.vlgmr.msra.gmra.mxu1 %vm162_vm3, %v631_v22 }
0x1077   :  { %2037 = vmatprep.mubr.msk.bf16.mxu1 %vm2426_vm0, %v2425_v0 }
0x1136   :  { %v669_v24 = vpop.f32.mrf.mxu1 }
0x1137   :  { %v675_v25 = vadd.f32 %v669_v24, %v627_v23 }
0x1138   :  { %v2023_v26 = vpop.f32.mrf.mxu1 }
0x1139   :  { %2213 = vtanh.f32 %v675_v25  ;;  %v1857_v30 = vmul.f32 -1.442695, %v675_v25 }
0x113a   :  { %v672_v27 = vpop.f32.mrf.mxu1 }
0x113b   :  { %2215 = vpow2.f32 %v1857_v30 }
0x113c   :  { %v2024_v28 = vpop.f32.mrf.mxu1 }
0x1146   :  { %v2214_v29 = vpop.eup %2213 }
0x1147   :  { %685 = vrot.lane.b32.xlu0 %v2214_v29, %s2418_s21 }
0x1148   :  { %v2216_v31 = vpop.eup %2215 }
0x1149   :  { %v679_v32 = vadd.f32 1.0, %v2216_v31 }
0x114b   :  { %2217 = vrcp.f32 %v679_v32 }
0x1158   :  { %v2218_v33 = vpop.eup %2217 }
0x1159   :  { %v683_v37 = vmul.f32 %v2218_v33, %v615_v17 }
0x11b9   :  { %v686_v35 = vpop.permute.xlu0 %685 }
0x11ba   :  { %v688_v36 = vmul.f32 %v2218_v33, %v686_v35 }
0x11bc   :  { %690 = vrot.lane.b32.xlu1 %v688_v36, %s2428_s15 }
0x122e   :  { %v691_v39 = vpop.permute.xlu1 %690 }
0x122f   :  { %v693_v40 = vadd.f32 %v691_v39, %v683_v37 }
0x1231   :  { %2219 = vtanh.f32 %v693_v40 }
0x123e   :  { %v2220_v41 = vpop.eup %2219 }
0x123f   :  { %696 = vrot.lane.b32.xlu0 %v2220_v41, %s2418_s21 }
0x12b1   :  { %v697_v42 = vpop.permute.xlu0 %696 }
0x12b2   :  { %v699_v43 = vmul.f32 %v2218_v33, %v697_v42 }
0x12b4   :  { %v706_v44 = vpack.c.bf16 %v699_v43, %v699_v43 }
0x12b6   :  { %708 = vrot.lane.b32.xlu1 %v706_v44, %s2428_s15 }
0x1328   :  { %v709_v45 = vpop.permute.xlu1 %708 }
0x1329   :  { %2030 = vmatmul.mubr.msk.bf16.vlgmr.msra.gmra.mxu0 %vm162_vm3, %v709_v45 }
0x132a   :  { %2045 = vmatprep.mubr.msk.bf16.mxu0 %vm2426_vm0, %v2425_v0  ;;  %2042 = vmatpush3.bf16.msra.mxu0 %v2628_v5 }
0x132b   :  { %2043 = vmatprep.subr.bf16.mxu0 %v2425_v0 }
0x132e   :  { %2044 = vmatpush3.bf16.msra.mxu0 %v2634_v9 }
0x132f   :  { %2057 = vmatprep.subr.bf16.mxu0 %v2425_v0 }
0x1331   :  { %2046 = vmatmul.mubr.bf16.vlgmr.msra.gmra.mxu0 %v2427_v8 }
0x1332   :  { %2058 = vmatpush3.bf16.msra.mxu0 %v2628_v5  ;;  %2061 = vmatprep.mubr.msk.bf16.mxu0 %vm2426_vm0, %v2425_v0 }
0x1333   :  { %2059 = vmatprep.subr.bf16.mxu0 %v2425_v0 }
0x1336   :  { %2060 = vmatpush3.bf16.msra.mxu0 %v2634_v9 }
0x1337   :  { %2073 = vmatprep.subr.bf16.mxu0 %v2425_v0 }
0x13e9   :  { %v747_v47 = vpop.f32.mrf.mxu0 }
0x13ea   :  { %v753_v48 = vadd.f32 %v747_v47, %v705_v46 }
0x13eb   :  { %v2031_v49 = vpop.f32.mrf.mxu0 }
0x13ec   :  { %2221 = vtanh.f32 %v753_v48  ;;  %v1859_v53 = vmul.f32 -1.442695, %v753_v48 }
0x13ed   :  { %v750_v50 = vpop.f32.mrf.mxu0 }
0x13ee   :  { %2223 = vpow2.f32 %v1859_v53 }
0x13ef   :  { %v2032_v51 = vpop.f32.mrf.mxu0 }
0x13f1   :  { %v908_v15 = vpop.f32.mrf.mxu0 }
0x13f3   :  { %v2047_v17 = vpop.f32.mrf.mxu0 }
0x13f5   :  { %v911_v18 = vpop.f32.mrf.mxu0 }
0x13f7   :  { %v2048_v19 = vpop.f32.mrf.mxu0 }
0x13f9   :  { %v2222_v52 = vpop.eup %2221 }
0x13fa   :  { %763 = vrot.lane.b32.xlu0 %v2222_v52, %s2418_s21 }
0x13fb   :  { %v2224_v54 = vpop.eup %2223 }
0x13fc   :  { %v757_v56 = vadd.f32 1.0, %v2224_v54 }
0x13fe   :  { %2225 = vrcp.f32 %v757_v56 }
0x140b   :  { %v2226_v57 = vpop.eup %2225 }
0x140c   :  { %v761_v61 = vmul.f32 %v2226_v57, %v693_v40 }
0x146c   :  { %v764_v58 = vpop.permute.xlu0 %763 }
0x146d   :  { %v766_v59 = vmul.f32 %v2226_v57, %v764_v58 }
0x146f   :  { %768 = vrot.lane.b32.xlu1 %v766_v59, %s2428_s15 }
0x1473   :  { %232 = vrot.lane.b32.xlu1 %v2518_v34, %s2428_s15 }
0x1477   :  { %389 = vrot.lane.b32.xlu1 %v2548_v16, %s2428_s15 }
0x147b   :  { %545 = vrot.lane.b32.xlu1 %v2578_v60, %s2428_s15  ;;  %v2153_v60 = vld [vmem:[#allocation9 + $0x8] sm:$0xff]  }
0x147c   :  { %2034 = vmatpush3.bf16.msra.mxu1 %v2153_v60 }
0x147d   :  { %2035 = vmatprep.subr.bf16.mxu1 %v2425_v0 }
0x147f   :  { %701 = vrot.lane.b32.xlu1 %v699_v43, %s2428_s15 }
0x1480   :  { %2036 = vmatpush3.bf16.msra.mxu1 %v2154_v6 }
0x1481   :  { %2049 = vmatprep.subr.bf16.mxu1 %v2425_v0 }
0x14e1   :  { %v769_v62 = vpop.permute.xlu1 %768 }
0x14e2   :  { %v771_v63 = vadd.f32 %v769_v62, %v761_v61 }
0x14e4   :  { %2227 = vtanh.f32 %v771_v63 }
0x14e5   :  { %v233_v1 = vpop.permute.xlu1 %232 }
0x14e6   :  { %236 = vst.msk [vmem:[#allocation3] sm:$0x3] %vm235_vm4, %v233_v1 }
0x14e9   :  { %v390_v3 = vpop.permute.xlu1 %389 }
0x14ea   :  { %392 = vst.msk [vmem:[#allocation3 + $0x4] sm:$0x3] %vm235_vm4, %v390_v3 }
0x14ed   :  { %v546_v34 = vpop.permute.xlu1 %545 }
0x14ee   :  { %548 = vst.msk [vmem:[#allocation3 + $0x8] sm:$0x3] %vm235_vm4, %v546_v34 }
0x14f1   :  { %v2228_v16 = vpop.eup %2227  ;;  %v702_v4 = vpop.permute.xlu1 %701 }
0x14f2   :  { %704 = vst.msk [vmem:[#allocation3 + $0xc] sm:$0x3] %vm235_vm4, %v702_v4  ;;  %774 = vrot.lane.b32.xlu0 %v2228_v16, %s2418_s21 }
0x14f6   :  { %311 = vrot.lane.b32.xlu0 %v2533_v55, %s2428_s15 }
0x14fa   :  { %467 = vrot.lane.b32.xlu0 %v2563_v38, %s2428_s15 }
0x14fe   :  { %623 = vrot.lane.b32.xlu0 %v2593_v20, %s2428_s15  ;;  %v1861_v20 = vld [vmem:[%s2822_s4 + $0x1] ss:$0 sm:$0xff] }
0x1564   :  { %v775_v55 = vpop.permute.xlu0 %774 }
0x1565   :  { %v777_v38 = vmul.f32 %v2226_v57, %v775_v55 }
0x1567   :  { %779 = vrot.lane.b32.xlu0 %v777_v38, %s2428_s15 }
0x1568   :  { %v312_v2 = vpop.permute.xlu0 %311 }
0x1569   :  { %314 = vst.msk [vmem:[#allocation3 + $0x2] sm:$0x3] %vm235_vm4, %v312_v2 }
0x156c   :  { %v468_v10 = vpop.permute.xlu0 %467 }
0x156d   :  { %470 = vst.msk [vmem:[#allocation3 + $0x6] sm:$0x3] %vm235_vm4, %v468_v10 }
0x1570   :  { %v624_v11 = vpop.permute.xlu0 %623 }
0x1571   :  { %626 = vst.msk [vmem:[#allocation3 + $0xa] sm:$0x3] %vm235_vm4, %v624_v11 }
0x1574   :  { %v783_v13 = vld [vmem:[#allocation3] sm:$0xff] }
0x15d9   :  { %v780_v12 = vpop.permute.xlu0 %779 }
0x15da   :  { %782 = vst.msk [vmem:[#allocation3 + $0xe] sm:$0x3] %vm235_vm4, %v780_v12 }
0x15e1   :  { %v784_v7 = vld [vmem:[#allocation3 + $0x8] sm:$0xff] }
0x15e2   :  { %v796_v14 = vpack.c.bf16 %v784_v7, %v783_v13 }
0x15e4   :  { %2038 = vmatmul.mubr.msk.bf16.vlgmr.msra.gmra.mxu1 %vm162_vm3, %v796_v14 }
0x15e5   :  { %2050 = vmatpush3.bf16.msra.mxu1 %v2628_v5  ;;  %2053 = vmatprep.mubr.msk.bf16.mxu1 %vm2426_vm0, %v2425_v0 }
0x15e6   :  { %2051 = vmatprep.subr.bf16.mxu1 %v2425_v0 }
0x15e9   :  { %2052 = vmatpush3.bf16.msra.mxu1 %v2634_v9 }
0x15ea   :  { %2065 = vmatprep.subr.bf16.mxu1 %v2425_v0 }
0x16a4   :  { %v852_v21 = vpop.f32.mrf.mxu1 }
0x16a5   :  { %v853_v22 = vadd.f32 %v1861_v20, %v852_v21 }
0x16a6   :  { %v2039_v23 = vpop.f32.mrf.mxu1 }
0x16a7   :  { %859 = vst [vmem:[#allocation2] sm:$0xff] %v853_v22 }
0x16a8   :  { %v855_v24 = vpop.f32.mrf.mxu1 }
0x16a9   :  { %v856_v25 = vadd.f32 %v1861_v20, %v855_v24 }
0x16aa   :  { %v2040_v26 = vpop.f32.mrf.mxu1 }
0x16ab   :  { %860 = vst [vmem:[#allocation2 + $0x8] sm:$0xff] %v856_v25 }
0x16ae   :  { %v861_v27 = vld [vmem:[#allocation2] sm:$0xf]  ;;  %v945_v46 = vld [vmem:[#allocation2 + $0x4] sm:$0xf] }
0x16af   :  { %v914_v28 = vadd.f32 %v908_v15, %v861_v27 }
0x16b1   :  { %2229 = vtanh.f32 %v914_v28  ;;  %v1867_v30 = vmul.f32 -1.442695, %v914_v28 }
0x16b2   :  { %v1023_v60 = vld [vmem:[#allocation2 + $0x8] sm:$0xf]  ;;  %v1101_v24 = vld [vmem:[#allocation2 + $0xc] sm:$0xf] }
0x16b3   :  { %2231 = vpow2.f32 %v1867_v30 }
0x16be   :  { %v2230_v29 = vpop.eup %2229 }
0x16bf   :  { %924 = vrot.lane.b32.xlu1 %v2230_v29, %s2418_s21 }
0x16c0   :  { %v2232_v31 = vpop.eup %2231 }
0x16c1   :  { %v918_v32 = vadd.f32 1.0, %v2232_v31 }
0x16c3   :  { %2233 = vrcp.f32 %v918_v32 }
0x16d0   :  { %v2234_v33 = vpop.eup %2233 }
0x16d1   :  { %v922_v37 = vmul.f32 0.0, %v2234_v33 }
0x1731   :  { %v925_v35 = vpop.permute.xlu1 %924 }
0x1732   :  { %v927_v36 = vmul.f32 %v2234_v33, %v925_v35 }
0x1734   :  { %929 = vrot.lane.b32.xlu0 %v927_v36, %s2428_s15 }
0x17a6   :  { %v930_v39 = vpop.permute.xlu0 %929 }
0x17a7   :  { %v932_v40 = vadd.f32 %v930_v39, %v922_v37 }
0x17a9   :  { %2235 = vtanh.f32 %v932_v40 }
0x17b6   :  { %v2236_v41 = vpop.eup %2235 }
0x17b7   :  { %935 = vrot.lane.b32.xlu1 %v2236_v41, %s2418_s21 }
0x1829   :  { %v936_v42 = vpop.permute.xlu1 %935 }
0x182a   :  { %v2663_v43 = vmul.f32 %v2234_v33, %v936_v42 }
0x182c   :  { %v946_v44 = vpack.c.bf16 %v2663_v43, %v2663_v43 }
0x182e   :  { %948 = vrot.lane.b32.xlu0 %v946_v44, %s2428_s15 }
0x18a0   :  { %v949_v45 = vpop.permute.xlu0 %948 }
0x18a1   :  { %2054 = vmatmul.mubr.msk.bf16.vlgmr.msra.gmra.mxu1 %vm162_vm3, %v949_v45 }
0x18a2   :  { %2066 = vmatpush3.bf16.msra.mxu1 %v2628_v5  ;;  %2069 = vmatprep.mubr.msk.bf16.mxu1 %vm2426_vm0, %v2425_v0 }
0x18a3   :  { %2067 = vmatprep.subr.bf16.mxu1 %v2425_v0 }
0x18a6   :  { %2068 = vmatpush3.bf16.msra.mxu1 %v2634_v9 }
0x18a7   :  { %2081 = vmatprep.subr.bf16.mxu1 %v2425_v0 }
0x1961   :  { %v987_v47 = vpop.f32.mrf.mxu1 }
0x1962   :  { %v993_v48 = vadd.f32 %v987_v47, %v945_v46  ;;  %v2703_v46 = vld [vmem:[#allocation10 + $0x28] sm:$0xff]   ;;  %v2158_v47 = vld [vmem:[#allocation9 + $0x10] sm:$0xff]  }
0x1963   :  { %v2055_v49 = vpop.f32.mrf.mxu1 }
0x1964   :  { %2237 = vtanh.f32 %v993_v48  ;;  %v1869_v53 = vmul.f32 -1.442695, %v993_v48  ;;  %v2709_v49 = vld [vmem:[#allocation10 + $0x20] sm:$0xff]  }
0x1965   :  { %v990_v50 = vpop.f32.mrf.mxu1 }
0x1966   :  { %2239 = vpow2.f32 %v1869_v53 }
0x1967   :  { %v2056_v51 = vpop.f32.mrf.mxu1 }
0x1971   :  { %v2238_v52 = vpop.eup %2237 }
0x1972   :  { %1003 = vrot.lane.b32.xlu1 %v2238_v52, %s2418_s21 }
0x1973   :  { %v2240_v54 = vpop.eup %2239 }
0x1974   :  { %v997_v56 = vadd.f32 1.0, %v2240_v54 }
0x1976   :  { %2241 = vrcp.f32 %v997_v56 }
0x1983   :  { %v2242_v57 = vpop.eup %2241 }
0x1984   :  { %v1001_v61 = vmul.f32 %v2242_v57, %v932_v40 }
0x19e4   :  { %v1004_v58 = vpop.permute.xlu1 %1003 }
0x19e5   :  { %v1006_v59 = vmul.f32 %v2242_v57, %v1004_v58 }
0x19e7   :  { %1008 = vrot.lane.b32.xlu0 %v1006_v59, %s2428_s15 }
0x1a59   :  { %v1009_v62 = vpop.permute.xlu0 %1008 }
0x1a5a   :  { %v1011_v63 = vadd.f32 %v1009_v62, %v1001_v61  ;;  %v1875_v62 = vld [vmem:[%s2822_s4 + $0x2] ss:$0 sm:$0xff] }
0x1a5c   :  { %2243 = vtanh.f32 %v1011_v63 }
0x1a69   :  { %v2244_v1 = vpop.eup %2243 }
0x1a6a   :  { %1014 = vrot.lane.b32.xlu1 %v2244_v1, %s2418_s21 }
0x1adc   :  { %v1015_v3 = vpop.permute.xlu1 %1014 }
0x1add   :  { %v2678_v34 = vmul.f32 %v2242_v57, %v1015_v3 }
0x1adf   :  { %v1024_v16 = vpack.c.bf16 %v2678_v34, %v2678_v34 }
0x1ae1   :  { %1026 = vrot.lane.b32.xlu0 %v1024_v16, %s2428_s15 }
0x1b53   :  { %v1027_v4 = vpop.permute.xlu0 %1026 }
0x1b54   :  { %2062 = vmatmul.mubr.msk.bf16.vlgmr.msra.gmra.mxu0 %vm162_vm3, %v1027_v4 }
0x1b55   :  { %2077 = vmatprep.mubr.msk.bf16.mxu0 %vm2426_vm0, %v2425_v0 }
0x1c14   :  { %v1065_v5 = vpop.f32.mrf.mxu0 }
0x1c15   :  { %v1071_v6 = vadd.f32 %v1065_v5, %v1023_v60 }
0x1c16   :  { %v2063_v55 = vpop.f32.mrf.mxu0 }
0x1c17   :  { %2245 = vtanh.f32 %v1071_v6  ;;  %v1871_v10 = vmul.f32 -1.442695, %v1071_v6 }
0x1c18   :  { %v1068_v9 = vpop.f32.mrf.mxu0 }
0x1c19   :  { %2247 = vpow2.f32 %v1871_v10 }
0x1c1a   :  { %v2064_v38 = vpop.f32.mrf.mxu0 }
0x1c24   :  { %v2246_v2 = vpop.eup %2245 }
0x1c25   :  { %1081 = vrot.lane.b32.xlu1 %v2246_v2, %s2418_s21 }
0x1c26   :  { %v2248_v11 = vpop.eup %2247 }
0x1c27   :  { %v1075_v12 = vadd.f32 1.0, %v2248_v11 }
0x1c29   :  { %2249 = vrcp.f32 %v1075_v12 }
0x1c36   :  { %v2250_v13 = vpop.eup %2249 }
0x1c37   :  { %v1079_v15 = vmul.f32 %v2250_v13, %v1011_v63 }
0x1c97   :  { %v1082_v7 = vpop.permute.xlu1 %1081 }
0x1c98   :  { %v1084_v14 = vmul.f32 %v2250_v13, %v1082_v7 }
0x1c9a   :  { %1086 = vrot.lane.b32.xlu0 %v1084_v14, %s2428_s15 }
0x1d0c   :  { %v1087_v17 = vpop.permute.xlu0 %1086 }
0x1d0d   :  { %v1089_v18 = vadd.f32 %v1087_v17, %v1079_v15 }
0x1d0f   :  { %2251 = vtanh.f32 %v1089_v18 }
0x1d1c   :  { %v2252_v19 = vpop.eup %2251 }
0x1d1d   :  { %1092 = vrot.lane.b32.xlu1 %v2252_v19, %s2418_s21 }
0x1d8f   :  { %v1093_v20 = vpop.permute.xlu1 %1092 }
0x1d90   :  { %v1095_v21 = vmul.f32 %v2250_v13, %v1093_v20 }
0x1d92   :  { %v1102_v22 = vpack.c.bf16 %v1095_v21, %v1095_v21 }
0x1d94   :  { %1104 = vrot.lane.b32.xlu0 %v1102_v22, %s2428_s15 }
0x1e06   :  { %v1105_v23 = vpop.permute.xlu0 %1104 }
0x1e07   :  { %2070 = vmatmul.mubr.msk.bf16.vlgmr.msra.gmra.mxu1 %vm162_vm3, %v1105_v23 }
0x1e08   :  { %2085 = vmatprep.mubr.msk.bf16.mxu1 %vm2426_vm0, %v2425_v0  ;;  %2082 = vmatpush3.bf16.msra.mxu1 %v2703_v46 }
0x1e09   :  { %2083 = vmatprep.subr.bf16.mxu1 %v2425_v0 }
0x1e0c   :  { %2084 = vmatpush3.bf16.msra.mxu1 %v2709_v49 }
0x1e0d   :  { %2097 = vmatprep.subr.bf16.mxu1 %v2425_v0 }
0x1e0f   :  { %2086 = vmatmul.mubr.bf16.vlgmr.msra.gmra.mxu1 %v2427_v8 }
0x1e10   :  { %2098 = vmatpush3.bf16.msra.mxu1 %v2703_v46  ;;  %2101 = vmatprep.mubr.msk.bf16.mxu1 %vm2426_vm0, %v2425_v0 }
0x1e11   :  { %2099 = vmatprep.subr.bf16.mxu1 %v2425_v0 }
0x1e14   :  { %2100 = vmatpush3.bf16.msra.mxu1 %v2709_v49 }
0x1e15   :  { %2113 = vmatprep.subr.bf16.mxu1 %v2425_v0 }
0x1ec7   :  { %v1143_v25 = vpop.f32.mrf.mxu1 }
0x1ec8   :  { %v1149_v26 = vadd.f32 %v1143_v25, %v1101_v24 }
0x1ec9   :  { %v2071_v27 = vpop.f32.mrf.mxu1 }
0x1eca   :  { %2253 = vtanh.f32 %v1149_v26  ;;  %v1873_v31 = vmul.f32 -1.442695, %v1149_v26 }
0x1ecb   :  { %v1146_v28 = vpop.f32.mrf.mxu1 }
0x1ecc   :  { %2255 = vpow2.f32 %v1873_v31 }
0x1ecd   :  { %v2072_v29 = vpop.f32.mrf.mxu1 }
0x1ecf   :  { %v1305_v57 = vpop.f32.mrf.mxu1 }
0x1ed1   :  { %v2087_v58 = vpop.f32.mrf.mxu1 }
0x1ed3   :  { %v1308_v59 = vpop.f32.mrf.mxu1 }
0x1ed5   :  { %v2088_v61 = vpop.f32.mrf.mxu1 }
0x1ed7   :  { %v2254_v30 = vpop.eup %2253 }
0x1ed8   :  { %1159 = vrot.lane.b32.xlu1 %v2254_v30, %s2418_s21 }
0x1ed9   :  { %v2256_v32 = vpop.eup %2255 }
0x1eda   :  { %v1153_v33 = vadd.f32 1.0, %v2256_v32 }
0x1edc   :  { %2257 = vrcp.f32 %v1153_v33 }
0x1ee9   :  { %v2258_v35 = vpop.eup %2257 }
0x1eea   :  { %v1157_v39 = vmul.f32 %v2258_v35, %v1089_v18 }
0x1f4a   :  { %v1160_v36 = vpop.permute.xlu1 %1159 }
0x1f4b   :  { %v1162_v37 = vmul.f32 %v2258_v35, %v1160_v36 }
0x1f4d   :  { %1164 = vrot.lane.b32.xlu0 %v1162_v37, %s2428_s15 }
0x1f51   :  { %940 = vrot.lane.b32.xlu0 %v2663_v43, %s2428_s15  ;;  %v2157_v43 = vld [vmem:[#allocation9 + $0x18] sm:$0xff]  }
0x1f52   :  { %2074 = vmatpush3.bf16.msra.mxu0 %v2157_v43 }
0x1f53   :  { %2075 = vmatprep.subr.bf16.mxu0 %v2425_v0 }
0x1f55   :  { %1097 = vrot.lane.b32.xlu0 %v1095_v21, %s2428_s15 }
0x1f56   :  { %2076 = vmatpush3.bf16.msra.mxu0 %v2158_v47 }
0x1f57   :  { %2089 = vmatprep.subr.bf16.mxu0 %v2425_v0 }
0x1fbf   :  { %v1165_v40 = vpop.permute.xlu0 %1164 }
0x1fc0   :  { %v1167_v41 = vadd.f32 %v1165_v40, %v1157_v39 }
0x1fc2   :  { %2259 = vtanh.f32 %v1167_v41 }
0x1fc3   :  { %v941_v42 = vpop.permute.xlu0 %940 }
0x1fc4   :  { %944 = vst.msk [vmem:[#allocation3] sm:$0xf] %vm943_vm5, %v941_v42 }
0x1fc7   :  { %v1098_v44 = vpop.permute.xlu0 %1097 }
0x1fc8   :  { %1100 = vst.msk [vmem:[#allocation3 + $0x8] sm:$0xf] %vm943_vm5, %v1098_v44 }
0x1fcf   :  { %v2260_v45 = vpop.eup %2259 }
0x1fd0   :  { %1170 = vrot.lane.b32.xlu1 %v2260_v45, %s2418_s21 }
0x1fd4   :  { %1019 = vrot.lane.b32.xlu1 %v2678_v34, %s2428_s15 }
0x2042   :  { %v1171_v48 = vpop.permute.xlu1 %1170 }
0x2043   :  { %v1173_v50 = vmul.f32 %v2258_v35, %v1171_v48 }
0x2045   :  { %1175 = vrot.lane.b32.xlu1 %v1173_v50, %s2428_s15 }
0x2046   :  { %v1020_v51 = vpop.permute.xlu1 %1019 }
0x2047   :  { %1022 = vst.msk [vmem:[#allocation3 + $0x4] sm:$0xf] %vm943_vm5, %v1020_v51 }
0x204e   :  { %v2723_v53 = vld [vmem:[#allocation3] sm:$0xff] }
0x20b7   :  { %v1176_v52 = vpop.permute.xlu1 %1175 }
0x20b8   :  { %1178 = vst.msk [vmem:[#allocation3 + $0xc] sm:$0xf] %vm943_vm5, %v1176_v52 }
0x20bf   :  { %v2725_v54 = vld [vmem:[#allocation3 + $0x8] sm:$0xff] }
0x20c0   :  { %v1193_v56 = vpack.c.bf16 %v2725_v54, %v2723_v53 }
0x20c2   :  { %2078 = vmatmul.mubr.msk.bf16.vlgmr.msra.gmra.mxu0 %vm162_vm3, %v1193_v56 }
0x20c3   :  { %2090 = vmatpush3.bf16.msra.mxu0 %v2703_v46  ;;  %2093 = vmatprep.mubr.msk.bf16.mxu0 %vm2426_vm0, %v2425_v0 }
0x20c4   :  { %2091 = vmatprep.subr.bf16.mxu0 %v2425_v0 }
0x20c7   :  { %2092 = vmatpush3.bf16.msra.mxu0 %v2709_v49 }
0x20c8   :  { %2105 = vmatprep.subr.bf16.mxu0 %v2425_v0 }
0x2182   :  { %v1249_v63 = vpop.f32.mrf.mxu0 }
0x2183   :  { %v1250_v1 = vadd.f32 %v1875_v62, %v1249_v63 }
0x2184   :  { %v2079_v3 = vpop.f32.mrf.mxu0 }
0x2185   :  { %1256 = vst [vmem:[#allocation2] sm:$0xff] %v1250_v1 }
0x2186   :  { %v1252_v34 = vpop.f32.mrf.mxu0 }
0x2187   :  { %v1253_v16 = vadd.f32 %v1875_v62, %v1252_v34 }
0x2188   :  { %v2080_v4 = vpop.f32.mrf.mxu0 }
0x2189   :  { %1257 = vst [vmem:[#allocation2 + $0x8] sm:$0xff] %v1253_v16 }
0x218c   :  { %v1258_v60 = vld [vmem:[#allocation2] sm:$0xf]  ;;  %v1341_v20 = vld [vmem:[#allocation2 + $0x4] sm:$0xf] }
0x218d   :  { %v1311_v5 = vadd.f32 %v1305_v57, %v1258_v60 }
0x218f   :  { %2261 = vtanh.f32 %v1311_v5  ;;  %v1881_v55 = vmul.f32 -1.442695, %v1311_v5 }
0x2190   :  { %v1419_v44 = vld [vmem:[#allocation2 + $0x8] sm:$0xf]  ;;  %v1497_v4 = vld [vmem:[#allocation2 + $0xc] sm:$0xf] }
0x2191   :  { %2263 = vpow2.f32 %v1881_v55 }
0x219c   :  { %v2262_v6 = vpop.eup %2261 }
0x219d   :  { %1321 = vrot.lane.b32.xlu0 %v2262_v6, %s2418_s21 }
0x219e   :  { %v2264_v9 = vpop.eup %2263 }
0x219f   :  { %v1315_v38 = vadd.f32 1.0, %v2264_v9 }
0x21a1   :  { %2265 = vrcp.f32 %v1315_v38 }
0x21ae   :  { %v2266_v2 = vpop.eup %2265 }
0x21af   :  { %v1319_v12 = vmul.f32 0.0, %v2266_v2 }
0x220f   :  { %v1322_v10 = vpop.permute.xlu0 %1321 }
0x2210   :  { %v1324_v11 = vmul.f32 %v2266_v2, %v1322_v10 }
0x2212   :  { %1326 = vrot.lane.b32.xlu1 %v1324_v11, %s2428_s15 }
0x2284   :  { %v1327_v13 = vpop.permute.xlu1 %1326 }
0x2285   :  { %v1329_v7 = vadd.f32 %v1327_v13, %v1319_v12 }
0x2287   :  { %2267 = vtanh.f32 %v1329_v7 }
0x2294   :  { %v2268_v14 = vpop.eup %2267 }
0x2295   :  { %1332 = vrot.lane.b32.xlu0 %v2268_v14, %s2418_s21 }
0x2307   :  { %v1333_v15 = vpop.permute.xlu0 %1332 }
0x2308   :  { %v2742_v17 = vmul.f32 %v2266_v2, %v1333_v15 }
0x230a   :  { %v1342_v18 = vpack.c.bf16 %v2742_v17, %v2742_v17 }
0x230c   :  { %1344 = vrot.lane.b32.xlu1 %v1342_v18, %s2428_s15 }
0x237e   :  { %v1345_v19 = vpop.permute.xlu1 %1344 }
0x237f   :  { %2094 = vmatmul.mubr.msk.bf16.vlgmr.msra.gmra.mxu0 %vm162_vm3, %v1345_v19 }
0x2380   :  { %2106 = vmatpush3.bf16.msra.mxu0 %v2703_v46  ;;  %2109 = vmatprep.mubr.msk.bf16.mxu0 %vm2426_vm0, %v2425_v0 }
0x2381   :  { %2107 = vmatprep.subr.bf16.mxu0 %v2425_v0 }
0x2384   :  { %2108 = vmatpush3.bf16.msra.mxu0 %v2709_v49 }
0x2385   :  { %2121 = vmatprep.subr.bf16.mxu0 %v2425_v0 }
0x243f   :  { %v1383_v21 = vpop.f32.mrf.mxu0 }
0x2440   :  { %v1389_v22 = vadd.f32 %v1383_v21, %v1341_v20 }
0x2441   :  { %v2095_v23 = vpop.f32.mrf.mxu0 }
0x2442   :  { %2269 = vtanh.f32 %v1389_v22  ;;  %v1883_v27 = vmul.f32 -1.442695, %v1389_v22  ;;  %v2163_v22 = vld [vmem:[#allocation10 + $0x38] sm:$0xff]   ;;  %v2162_v23 = vld [vmem:[#allocation9 + $0x20] sm:$0xff]  }
0x2443   :  { %v1386_v24 = vpop.f32.mrf.mxu0 }
0x2444   :  { %2271 = vpow2.f32 %v1883_v27  ;;  %v2164_v24 = vld [vmem:[#allocation10 + $0x30] sm:$0xff]  }
0x2445   :  { %v2096_v25 = vpop.f32.mrf.mxu0 }
0x244f   :  { %v2270_v26 = vpop.eup %2269 }
0x2450   :  { %1399 = vrot.lane.b32.xlu0 %v2270_v26, %s2418_s21 }
0x2451   :  { %v2272_v28 = vpop.eup %2271 }
0x2452   :  { %v1393_v29 = vadd.f32 1.0, %v2272_v28 }
0x2454   :  { %2273 = vrcp.f32 %v1393_v29 }
0x2461   :  { %v2274_v30 = vpop.eup %2273 }
0x2462   :  { %v1397_v33 = vmul.f32 %v2274_v30, %v1329_v7 }
0x24c2   :  { %v1400_v31 = vpop.permute.xlu0 %1399 }
0x24c3   :  { %v1402_v32 = vmul.f32 %v2274_v30, %v1400_v31 }
0x24c5   :  { %1404 = vrot.lane.b32.xlu1 %v1402_v32, %s2428_s15 }
0x2537   :  { %v1405_v35 = vpop.permute.xlu1 %1404 }
0x2538   :  { %v1407_v36 = vadd.f32 %v1405_v35, %v1397_v33 }
0x253a   :  { %2275 = vtanh.f32 %v1407_v36 }
0x2547   :  { %v2276_v37 = vpop.eup %2275 }
0x2548   :  { %1410 = vrot.lane.b32.xlu0 %v2276_v37, %s2418_s21 }
0x25ba   :  { %v1411_v39 = vpop.permute.xlu0 %1410 }
0x25bb   :  { %v2757_v40 = vmul.f32 %v2274_v30, %v1411_v39 }
0x25bd   :  { %v1420_v41 = vpack.c.bf16 %v2757_v40, %v2757_v40 }
0x25bf   :  { %1422 = vrot.lane.b32.xlu1 %v1420_v41, %s2428_s15 }
0x2631   :  { %v1423_v42 = vpop.permute.xlu1 %1422 }
0x2632   :  { %2102 = vmatmul.mubr.msk.bf16.vlgmr.msra.gmra.mxu1 %vm162_vm3, %v1423_v42 }
0x2633   :  { %2117 = vmatprep.mubr.msk.bf16.mxu1 %vm2426_vm0, %v2425_v0 }
0x26f2   :  { %v1461_v45 = vpop.f32.mrf.mxu1 }
0x26f3   :  { %v1467_v43 = vadd.f32 %v1461_v45, %v1419_v44 }
0x26f4   :  { %v2103_v46 = vpop.f32.mrf.mxu1 }
0x26f5   :  { %2277 = vtanh.f32 %v1467_v43  ;;  %v1885_v50 = vmul.f32 -1.442695, %v1467_v43 }
0x26f6   :  { %v1464_v47 = vpop.f32.mrf.mxu1 }
0x26f7   :  { %2279 = vpow2.f32 %v1885_v50 }
0x26f8   :  { %v2104_v48 = vpop.f32.mrf.mxu1 }
0x2702   :  { %v2278_v49 = vpop.eup %2277 }
0x2703   :  { %1477 = vrot.lane.b32.xlu0 %v2278_v49, %s2418_s21 }
0x2704   :  { %v2280_v51 = vpop.eup %2279 }
0x2705   :  { %v1471_v52 = vadd.f32 1.0, %v2280_v51 }
0x2707   :  { %2281 = vrcp.f32 %v1471_v52 }
0x2714   :  { %v2282_v56 = vpop.eup %2281 }
0x2715   :  { %v1475_v59 = vmul.f32 %v2282_v56, %v1407_v36  ;;  %v1889_v36 = vld [vmem:[%s2822_s4 + $0x3] ss:$0 sm:$0xff]  ;;  %s2429_s4 = smov [#allocation12]  }
0x2716   :  { %s1826_s23 = sshll.u32 %s2429_s4, 4  ;;  %s1827_s23 = int_to_ptr.vmem [resolvable:$true] %s1826_s23 }
0x2717   :  { %s2389_s24 = scalar_lea.vmem %s1827_s23, 256  ;;  %p2394_p7 = scmp.lt.s32.totalorder %s1827_s23, %s1827_s23 }
0x2718   :  { %p2390_p6 = scmp.ne.s32.totalorder %s1827_s23, %s2389_s24  ;;  %p2395_p8 = scmp.lt.s32.totalorder %s2389_s24, %s2389_s24 }
0x271a   :  { %p2396_p9 = por %p2395_p8, %p2394_p7 }
0x271c   :  { %p2397_p10 = pnand %p2396_p9, %p2390_p6 }
0x2775   :  { %v1478_v57 = vpop.permute.xlu0 %1477 }
0x2776   :  { %v1480_v58 = vmul.f32 %v2282_v56, %v1478_v57 }
0x2778   :  { %1482 = vrot.lane.b32.xlu1 %v1480_v58, %s2428_s15 }
0x27ea   :  { %v1483_v61 = vpop.permute.xlu1 %1482 }
0x27eb   :  { %v1485_v62 = vadd.f32 %v1483_v61, %v1475_v59 }
0x27ed   :  { %2283 = vtanh.f32 %v1485_v62 }
0x27fa   :  { %v2284_v63 = vpop.eup %2283 }
0x27fb   :  { %1488 = vrot.lane.b32.xlu0 %v2284_v63, %s2418_s21 }
0x286d   :  { %v1489_v1 = vpop.permute.xlu0 %1488 }
0x286e   :  { %v1491_v3 = vmul.f32 %v2282_v56, %v1489_v1 }
0x2870   :  { %v1498_v34 = vpack.c.bf16 %v1491_v3, %v1491_v3 }
0x2872   :  { %1500 = vrot.lane.b32.xlu1 %v1498_v34, %s2428_s15 }
0x28e4   :  { %v1501_v16 = vpop.permute.xlu1 %1500 }
0x28e5   :  { %2110 = vmatmul.mubr.msk.bf16.vlgmr.msra.gmra.mxu0 %vm162_vm3, %v1501_v16 }
0x28e6   :  { %2125 = vmatprep.mubr.msk.bf16.mxu0 %vm2426_vm0, %v2425_v0  ;;  %2122 = vmatpush3.bf16.msra.mxu0 %v2163_v22 }
0x28e7   :  { %2123 = vmatprep.subr.bf16.mxu0 %v2425_v0 }
0x28ea   :  { %2124 = vmatpush3.bf16.msra.mxu0 %v2164_v24 }
0x28ed   :  { %2126 = vmatmul.mubr.bf16.vlgmr.msra.gmra.mxu0 %v2427_v8 }
0x29a5   :  { %v1539_v60 = vpop.f32.mrf.mxu0 }
0x29a6   :  { %v1545_v5 = vadd.f32 %v1539_v60, %v1497_v4 }
0x29a7   :  { %v2111_v6 = vpop.f32.mrf.mxu0 }
0x29a8   :  { %2285 = vtanh.f32 %v1545_v5  ;;  %v1887_v2 = vmul.f32 -1.442695, %v1545_v5 }
0x29a9   :  { %v1542_v55 = vpop.f32.mrf.mxu0 }
0x29aa   :  { %2287 = vpow2.f32 %v1887_v2 }
0x29ab   :  { %v2112_v9 = vpop.f32.mrf.mxu0 }
0x29ad   :  { %v1701_v8 = vpop.f32.mrf.mxu0 }
0x29af   :  { %v2127_v32 = vpop.f32.mrf.mxu0 }
0x29b1   :  { %v1704_v33 = vpop.f32.mrf.mxu0 }
0x29b3   :  { %v2128_v35 = vpop.f32.mrf.mxu0 }
0x29b5   :  { %v2286_v38 = vpop.eup %2285 }
0x29b6   :  { %1555 = vrot.lane.b32.xlu0 %v2286_v38, %s2418_s21 }
0x29b7   :  { %v2288_v10 = vpop.eup %2287 }
0x29b8   :  { %v1549_v11 = vadd.f32 1.0, %v2288_v10 }
0x29ba   :  { %2289 = vrcp.f32 %v1549_v11 }
0x29c7   :  { %v2290_v12 = vpop.eup %2289 }
0x29c8   :  { %v1553_v14 = vmul.f32 %v2290_v12, %v1485_v62 }
0x2a28   :  { %v1556_v13 = vpop.permute.xlu0 %1555 }
0x2a29   :  { %v1558_v7 = vmul.f32 %v2290_v12, %v1556_v13 }
0x2a2b   :  { %1560 = vrot.lane.b32.xlu1 %v1558_v7, %s2428_s15 }
0x2a2f   :  { %1337 = vrot.lane.b32.xlu1 %v2742_v17, %s2428_s15  ;;  %v2161_v17 = vld [vmem:[#allocation9 + $0x28] sm:$0xff]  }
0x2a30   :  { %2114 = vmatpush3.bf16.msra.mxu1 %v2161_v17 }
0x2a31   :  { %2115 = vmatprep.subr.bf16.mxu1 %v2425_v0 }
0x2a33   :  { %1493 = vrot.lane.b32.xlu1 %v1491_v3, %s2428_s15 }
0x2a34   :  { %2116 = vmatpush3.bf16.msra.mxu1 %v2162_v23 }
0x2a35   :  { %2129 = vmatprep.subr.bf16.mxu1 %v2425_v0 }
0x2a9d   :  { %v1561_v15 = vpop.permute.xlu1 %1560 }
0x2a9e   :  { %v1563_v18 = vadd.f32 %v1561_v15, %v1553_v14 }
0x2aa0   :  { %2291 = vtanh.f32 %v1563_v18 }
0x2aa1   :  { %v1338_v19 = vpop.permute.xlu1 %1337 }
0x2aa2   :  { %1340 = vst.msk [vmem:[#allocation3] sm:$0xf] %vm943_vm5, %v1338_v19 }
0x2aa5   :  { %v1494_v20 = vpop.permute.xlu1 %1493 }
0x2aa6   :  { %1496 = vst.msk [vmem:[#allocation3 + $0x8] sm:$0xf] %vm943_vm5, %v1494_v20 }
0x2aad   :  { %v2292_v21 = vpop.eup %2291 }
0x2aae   :  { %1566 = vrot.lane.b32.xlu0 %v2292_v21, %s2418_s21 }
0x2ab2   :  { %1415 = vrot.lane.b32.xlu0 %v2757_v40, %s2428_s15 }
0x2b20   :  { %v1567_v25 = vpop.permute.xlu0 %1566 }
0x2b21   :  { %v1569_v26 = vmul.f32 %v2290_v12, %v1567_v25 }
0x2b23   :  { %1571 = vrot.lane.b32.xlu0 %v1569_v26, %s2428_s15 }
0x2b24   :  { %v1416_v27 = vpop.permute.xlu0 %1415 }
0x2b25   :  { %1418 = vst.msk [vmem:[#allocation3 + $0x4] sm:$0xf] %vm943_vm5, %v1416_v27 }
0x2b2c   :  { %v1575_v29 = vld [vmem:[#allocation3] sm:$0xff] }
0x2b95   :  { %v1572_v28 = vpop.permute.xlu0 %1571 }
0x2b96   :  { %1574 = vst.msk [vmem:[#allocation3 + $0xc] sm:$0xf] %vm943_vm5, %v1572_v28 }
0x2b9d   :  { %v1576_v30 = vld [vmem:[#allocation3 + $0x8] sm:$0xff] }
0x2b9e   :  { %v1589_v31 = vpack.c.bf16 %v1576_v30, %v1575_v29 }
0x2ba0   :  { %2118 = vmatmul.mubr.msk.bf16.vlgmr.msra.gmra.mxu1 %vm162_vm3, %v1589_v31 }
0x2ba1   :  { %2130 = vmatpush3.bf16.msra.mxu1 %v2163_v22  ;;  %2133 = vmatprep.mubr.msk.bf16.mxu1 %vm2426_vm0, %v2425_v0 }
0x2ba2   :  { %2131 = vmatprep.subr.bf16.mxu1 %v2425_v0 }
0x2ba5   :  { %2132 = vmatpush3.bf16.msra.mxu1 %v2164_v24 }
0x2c60   :  { %v1645_v37 = vpop.f32.mrf.mxu1 }
0x2c61   :  { %v1646_v39 = vadd.f32 %v1889_v36, %v1645_v37 }
0x2c62   :  { %v2119_v40 = vpop.f32.mrf.mxu1 }
0x2c63   :  { %1652 = vst [vmem:[#allocation2] sm:$0xff] %v1646_v39  ;;  %v1707_v41 = vadd.f32 %v1701_v8, %v1646_v39 }
0x2c64   :  { %v1648_v42 = vpop.f32.mrf.mxu1 }
0x2c65   :  { %v1649_v44 = vadd.f32 %v1889_v36, %v1648_v42  ;;  %2293 = vtanh.f32 %v1707_v41  ;;  %v1895_v43 = vmul.f32 -1.442695, %v1707_v41 }
0x2c66   :  { %v2120_v45 = vpop.f32.mrf.mxu1 }
0x2c67   :  { %1653 = vst [vmem:[#allocation2 + $0x8] sm:$0xff] %v1649_v44  ;;  %2295 = vpow2.f32 %v1895_v43 }
0x2c72   :  { %v2294_v0 = vpop.eup %2293 }
0x2c73   :  { %1717 = vrot.lane.b32.xlu1 %v2294_v0, %s2418_s21 }
0x2c74   :  { %v2296_v46 = vpop.eup %2295 }
0x2c75   :  { %v1711_v47 = vadd.f32 1.0, %v2296_v46 }
0x2c77   :  { %2297 = vrcp.f32 %v1711_v47 }
0x2c84   :  { %v2298_v48 = vpop.eup %2297 }
0x2c85   :  { %v1715_v51 = vmul.f32 0.0, %v2298_v48 }
0x2ce5   :  { %v1718_v49 = vpop.permute.xlu1 %1717 }
0x2ce6   :  { %v1720_v50 = vmul.f32 %v2298_v48, %v1718_v49 }
0x2ce8   :  { %1722 = vrot.lane.b32.xlu0 %v1720_v50, %s2428_s15 }
0x2d5a   :  { %v1723_v52 = vpop.permute.xlu0 %1722 }
0x2d5b   :  { %v1725_v56 = vadd.f32 %v1723_v52, %v1715_v51 }
0x2d5d   :  { %2299 = vtanh.f32 %v1725_v56 }
0x2d6a   :  { %v2300_v57 = vpop.eup %2299 }
0x2d6b   :  { %1728 = vrot.lane.b32.xlu1 %v2300_v57, %s2418_s21 }
0x2ddd   :  { %v1729_v58 = vpop.permute.xlu1 %1728 }
0x2dde   :  { %v1731_v59 = vmul.f32 %v2298_v48, %v1729_v58 }
0x2de0   :  { %v1738_v61 = vpack.c.bf16 %v1731_v59, %v1731_v59 }
0x2de2   :  { %1740 = vrot.lane.b32.xlu0 %v1738_v61, %s2428_s15 }
0x2e54   :  { %v1741_v62 = vpop.permute.xlu0 %1740 }
0x2e55   :  { %2134 = vmatmul.mubr.msk.bf16.vlgmr.msra.gmra.mxu1 %vm162_vm3, %v1741_v62 }
0x2f15   :  { %v1779_v63 = vpop.f32.mrf.mxu1 }
0x2f16   :  { %v1785_v1 = vadd.f32 %v1779_v63, %v1649_v44 }
0x2f17   :  { %v2135_v3 = vpop.f32.mrf.mxu1 }
0x2f18   :  { %2301 = vtanh.f32 %v1785_v1  ;;  %v1897_v60 = vmul.f32 -1.442695, %v1785_v1 }
0x2f19   :  { %v1782_v34 = vpop.f32.mrf.mxu1 }
0x2f1a   :  { %2303 = vpow2.f32 %v1897_v60 }
0x2f1b   :  { %v2136_v16 = vpop.f32.mrf.mxu1 }
0x2f25   :  { %v2302_v4 = vpop.eup %2301 }
0x2f26   :  { %1795 = vrot.lane.b32.xlu1 %v2302_v4, %s2418_s21 }
0x2f27   :  { %v2304_v5 = vpop.eup %2303 }
0x2f28   :  { %v1789_v6 = vadd.f32 1.0, %v2304_v5 }
0x2f2a   :  { %2305 = vrcp.f32 %v1789_v6 }
0x2f37   :  { %v2306_v55 = vpop.eup %2305 }
0x2f38   :  { %v1793_v2 = vmul.f32 %v2306_v55, %v1725_v56 }
0x2f98   :  { %v1796_v9 = vpop.permute.xlu1 %1795 }
0x2f99   :  { %v1798_v38 = vmul.f32 %v2306_v55, %v1796_v9 }
0x2f9b   :  { %1800 = vrot.lane.b32.xlu0 %v1798_v38, %s2428_s15 }
0x2f9f   :  { %1733 = vrot.lane.b32.xlu0 %v1731_v59, %s2428_s15 }
0x300d   :  { %v1801_v10 = vpop.permute.xlu0 %1800 }
0x300e   :  { %v1803_v11 = vadd.f32 %v1801_v10, %v1793_v2 }
0x3010   :  { %2307 = vtanh.f32 %v1803_v11 }
0x3011   :  { %v1734_v12 = vpop.permute.xlu0 %1733 }
0x3012   :  { %1736 = vst.msk [vmem:[#allocation3] sm:$0xff] %vm162_vm3, %v1734_v12 }
0x3019   :  { %v1815_v13 = vld [vmem:[#allocation3] sm:$0xff] }
0x301a   :  { %v1817_v7 = vadd.f32 %v1815_v13, %v2723_v53 }
0x301c   :  { %1819 = vst.msk [vmem:[#allocation12] sm:$0xff] %vm162_vm3, %v1817_v7 }
0x301d   :  { %v2308_v14 = vpop.eup %2307 }
0x301e   :  { %1806 = vrot.lane.b32.xlu1 %v2308_v14, %s2418_s21 }
0x3090   :  { %v1807_v15 = vpop.permute.xlu1 %1806 }
0x3091   :  { %v1809_v18 = vmul.f32 %v2306_v55, %v1807_v15 }
0x3093   :  { %1811 = vrot.lane.b32.xlu1 %v1809_v18, %s2428_s15 }
0x3105   :  { %v1812_v19 = vpop.permute.xlu1 %1811 }
0x3106   :  { %1814 = vst.msk [vmem:[#allocation3 + $0x8] sm:$0xff] %vm162_vm3, %v1812_v19 }
0x310d   :  { %v1816_v20 = vld [vmem:[#allocation3 + $0x8] sm:$0xff] }
0x310e   :  { %v1818_v21 = vadd.f32 %v1816_v20, %v2725_v54 }
0x3110   :  { %1820 = vst.msk [vmem:[#allocation12 + $0x8] sm:$0xff] %vm162_vm3, %v1818_v21 }
0x3111   :  { %2400 = shalt.err (!%p2397_p10)
}
0x3112   :  { %1832 = dma.vmem_to_hbm [thread:$0]  %s1827_s23, 256, %s2823_s5, [#allocation6], %s2421_s28, %s2421_s28, %s2422_s29  }
0x3113   :  { %2415 = dma.done.wait [#allocation6], 256  }
0x3114   :  { %2416 = vsyncadd [#allocation6], 4294967040 }
0x3115   :  { %1836 = vsyncpa [#allocation5], 1 }
0x3116   :  { %1837 = vsyncpa [#allocation8], 1 }
0x3117   :  { %1838 = vsyncpa [#allocation11], 1 }
0x3118   :  { %1839 = vsyncpa [#allocation6], 1 }

</bundles_post_ra>
